<compile_context>
chip_gen: v6e
topology: v6e:2x2x1
jax: 0.10.0
libtpu: 0.0.40
codegen_flags: <defaults>
</compile_context>

<pallas_src>
import jax
import jax.numpy as jnp
import numpy as np
from jax.experimental import pallas as pl
from jax.experimental.pallas import tpu as pltpu

FEATURES = 4        # `features`
EMBEDDING = 16      # time-embedding width E
HIDDEN = 64         # hidden width of the injected `net`
NFREQ = 32          # sinusoidal frequencies -> cos/sin -> 64 embedding inputs
TEMB_HIDDEN = 256   # TimeEmbedding hidden width

GROUPS = 4               # block-diagonal MXU packing factor (256x256 operand); 2 on v5e
DEFAULT_CHUNK_COLS = 4096  # lane columns per grid step => GROUPS*4096 = 16384 rows/step


def _round_up(n, m):
    return ((n + m - 1) // m) * m


def _silu(v):
    # Exact identity: silu(v) = v*sigmoid(v) = 0.5*v*(1 + tanh(v/2)).
    # Single EUP op (tanh) per element; no approximate reciprocal.
    return 0.5 * v * (1.0 + jnp.tanh(0.5 * v))


# --------------------------------------------------------------------------- #
# Kernel 1: deduplicated TimeEmbedding folded through the first net layer.
# Runs once per t-group (tiny), entirely in f32 for parity:
#   out[g] = silu(cat(cos,sin)(t_g) @ W1 + b1) @ W2 + b2   (= temb)
#            then temb @ wn1[F:, :] + bn1                   (= per-group layer-1 bias)
# --------------------------------------------------------------------------- #
def _temb_bias_kernel(t_ref, freqs_ref, w1c_ref, w1s_ref, b1_ref, w2_ref, b2_ref,
                      wn1e_ref, bn1_ref, out_ref):
    ang = t_ref[...] * freqs_ref[...]                      # (rt,1)*(1,32) -> (rt,32)
    h = (jnp.dot(jnp.cos(ang), w1c_ref[...], preferred_element_type=jnp.float32)
         + jnp.dot(jnp.sin(ang), w1s_ref[...], preferred_element_type=jnp.float32)
         + b1_ref[...])
    h = _silu(h)
    temb = jnp.dot(h, w2_ref[...], preferred_element_type=jnp.float32) + b2_ref[...]
    out_ref[...] = (jnp.dot(temb, wn1e_ref[...], preferred_element_type=jnp.float32)
                    + bn1_ref[...])                        # (rt, HIDDEN) f32


# --------------------------------------------------------------------------- #
# Kernel 2: the hot path.  Activations are (GROUPS*C, cols) -- channels of GROUPS
# independent row-groups stacked on sublanes, flattened rows on the 128-lane axis.
# Weights are block-diagonal bf16 (layer 2 is a full 256x256 MXU operand).
# Layer-1 bias is the folded per-t-group bias column selected by the grid.
# --------------------------------------------------------------------------- #
def _packed_mlp_kernel(xp_ref, b1_ref, w1_ref, w2_ref, b2_ref, w3_ref, b3_ref,
                       out_ref):
    xp = xp_ref[0]                                                  # (G*F, cc) bf16
    h1 = jnp.dot(w1_ref[...], xp, preferred_element_type=jnp.float32) + b1_ref[0]
    h1 = _silu(h1).astype(jnp.bfloat16)                             # (G*H, cc)
    h2 = jnp.dot(w2_ref[...], h1, preferred_element_type=jnp.float32) + b2_ref[...]
    h2 = _silu(h2).astype(jnp.bfloat16)                             # (G*H, cc)
    out_ref[0] = (jnp.dot(w3_ref[...], h2, preferred_element_type=jnp.float32)
                  + b3_ref[...])                                    # (G*F, cc) f32


# --------------------------------------------------------------------------- #
# Parameters
# --------------------------------------------------------------------------- #
def init_params(key):
    ks = jax.random.split(key, 5)

    def lin(k, fin, fout):
        kw, kb = jax.random.split(k)
        lim = 1.0 / np.sqrt(fin)
        w = jax.random.uniform(kw, (fin, fout), jnp.float32, -lim, lim)
        b = jax.random.uniform(kb, (1, fout), jnp.float32, -lim, lim)
        return w, b

    w1, b1 = lin(ks[0], 2 * NFREQ, TEMB_HIDDEN)          # TimeEmbedding Linear(64,256)
    w2, b2 = lin(ks[1], TEMB_HIDDEN, EMBEDDING)          # TimeEmbedding Linear(256,E)
    wn1, bn1 = lin(ks[2], FEATURES + EMBEDDING, HIDDEN)  # net Linear(F+E,H)
    wn2, bn2 = lin(ks[3], HIDDEN, HIDDEN)                # net Linear(H,H)
    wn3, bn3 = lin(ks[4], HIDDEN, FEATURES)              # net Linear(H,F)

    freqs = ((jnp.pi / 2.0) * (1e3 ** jnp.linspace(0.0, 1.0, NFREQ))
             ).astype(jnp.float32).reshape(1, NFREQ)

    return dict(freqs=freqs, w1=w1, b1=b1, w2=w2, b2=b2,
                wn1=wn1, bn1=bn1, wn2=wn2, bn2=bn2, wn3=wn3, bn3=bn3)


def pack_kernel_params(p, groups=GROUPS):
    """Kernel-layout params: f32 time-embedding weights, bf16 block-diagonal
    (kron(I_G, W^T)) row-MLP weights, column-vector biases."""
    f = FEATURES
    eye = jnp.eye(groups, dtype=jnp.float32)
    return dict(
        # time-embedding / folded layer-1 bias kernel (f32, tiny)
        freqs=p["freqs"],                                  # (1, 32)
        w1c=p["w1"][:NFREQ], w1s=p["w1"][NFREQ:],          # (32, 256) each
        b1=p["b1"],                                        # (1, 256)
        w2=p["w2"], b2=p["b2"],                            # (256, 16), (1, 16)
        wn1e=p["wn1"][f:], bn1=p["bn1"],                   # (16, 64), (1, 64)
        # block-diagonal packed row-MLP weights (bf16 operands, f32 accumulation)
        w1p=jnp.kron(eye, p["wn1"][:f].T).astype(jnp.bfloat16),   # (G*H, G*F)
        w2p=jnp.kron(eye, p["wn2"].T).astype(jnp.bfloat16),       # (G*H, G*H)
        w3p=jnp.kron(eye, p["wn3"].T).astype(jnp.bfloat16),       # (G*F, G*H)
        b2p=jnp.tile(p["bn2"].T, (groups, 1)),                    # (G*H, 1) f32
        b3p=jnp.tile(p["bn3"].T, (groups, 1)),                    # (G*F, 1) f32
    )


# --------------------------------------------------------------------------- #
# Wrappers
# --------------------------------------------------------------------------- #
def _layer1_bias_table(kp, t_grp):
    """t_grp (n_grp, 1) f32 -> folded per-group layer-1 bias (n_grp, HIDDEN) f32."""
    n_grp = t_grp.shape[0]
    n_pad = _round_up(n_grp, 8)
    rt = min(512, n_pad)
    t_p = jnp.pad(t_grp, ((0, n_pad - n_grp), (0, 0)))
    out = pl.pallas_call(
        _temb_bias_kernel,
        out_shape=jax.ShapeDtypeStruct((n_pad, HIDDEN), jnp.float32),
        grid=(pl.cdiv(n_pad, rt),),
        in_specs=[
            pl.BlockSpec((rt, 1), lambda i: (i, 0)),
            pl.BlockSpec((1, NFREQ), lambda i: (0, 0)),
            pl.BlockSpec((NFREQ, TEMB_HIDDEN), lambda i: (0, 0)),
            pl.BlockSpec((NFREQ, TEMB_HIDDEN), lambda i: (0, 0)),
            pl.BlockSpec((1, TEMB_HIDDEN), lambda i: (0, 0)),
            pl.BlockSpec((TEMB_HIDDEN, EMBEDDING), lambda i: (0, 0)),
            pl.BlockSpec((1, EMBEDDING), lambda i: (0, 0)),
            pl.BlockSpec((EMBEDDING, HIDDEN), lambda i: (0, 0)),
            pl.BlockSpec((1, HIDDEN), lambda i: (0, 0)),
        ],
        out_specs=pl.BlockSpec((rt, HIDDEN), lambda i: (i, 0)),
        compiler_params=pltpu.CompilerParams(
            dimension_semantics=("parallel",)),
    )(t_p, kp["freqs"], kp["w1c"], kp["w1s"], kp["b1"], kp["w2"], kp["b2"],
      kp["wn1e"], kp["bn1"])
    return out[:n_grp]


def score_unet_forward(kp, x, t, *, chunk_cols=DEFAULT_CHUNK_COLS):
    """ScoreUNet.forward: x (..., FEATURES); t broadcastable against x.shape[:-1]."""
    groups = kp["w2p"].shape[0] // HIDDEN
    f = FEATURES
    gh, gf = groups * HIDDEN, groups * f

    t_arr = jnp.asarray(t, jnp.float32)
    batch_shape = jnp.broadcast_shapes(x.shape[:-1], t_arr.shape)
    nb = len(batch_shape)

    # ---- split batch_shape = lead (t varies) x inner (t constant, contiguous) ----
    ts = (1,) * (nb - t_arr.ndim) + tuple(t_arr.shape)
    k = 0
    while k < nb and ts[nb - 1 - k] == 1:
        k += 1
    lead = batch_shape[:nb - k]
    inner = int(np.prod(batch_shape[nb - k:], dtype=np.int64)) if k else 1
    n_grp = int(np.prod(lead, dtype=np.int64)) if lead else 1

    t_lead = t_arr.reshape(ts)[(Ellipsis,) + (0,) * k]
    t_grp = jnp.broadcast_to(t_lead, lead).reshape(n_grp, 1)

    # ---- deduplicated TimeEmbedding, folded into a per-group layer-1 bias ----
    b1_grp = _layer1_bias_table(kp, t_grp)               # (n_grp, HIDDEN) f32
    b1_tab = jnp.tile(b1_grp, (1, groups))[..., None]    # (n_grp, G*HIDDEN, 1) f32

    # ---- pack x into the lane-dense (G*F, cols) layout, one slab per t-group ----
    xb = jnp.broadcast_to(x.astype(jnp.float32), batch_shape + (f,))
    xg = xb.reshape(n_grp, inner, f)
    inner_p = _round_up(inner, groups)
    if inner_p != inner:
        xg = jnp.pad(xg, ((0, 0), (0, inner_p - inner), (0, 0)))
    cols = inner_p // groups
    xp = jnp.transpose(xg.reshape(n_grp, groups, cols, f), (0, 1, 3, 2))
    xp = xp.reshape(n_grp, gf, cols).astype(jnp.bfloat16)

    # ---- grid: (t-group, column-chunk); >=2 steps in typical batched use ----
    cc = cols if cols <= chunk_cols else max(128, (chunk_cols // 128) * 128)
    n_chunks = pl.cdiv(cols, cc)

    out_p = pl.pallas_call(
        _packed_mlp_kernel,
        out_shape=jax.ShapeDtypeStruct((n_grp, gf, cols), jnp.float32),
        grid=(n_grp, n_chunks),
        in_specs=[
            pl.BlockSpec((1, gf, cc), lambda g, c: (g, 0, c)),
            pl.BlockSpec((1, gh, 1), lambda g, c: (g, 0, 0)),
            pl.BlockSpec((gh, gf), lambda g, c: (0, 0)),
            pl.BlockSpec((gh, gh), lambda g, c: (0, 0)),
            pl.BlockSpec((gh, 1), lambda g, c: (0, 0)),
            pl.BlockSpec((gf, gh), lambda g, c: (0, 0)),
            pl.BlockSpec((gf, 1), lambda g, c: (0, 0)),
        ],
        out_specs=pl.BlockSpec((1, gf, cc), lambda g, c: (g, 0, c)),
        compiler_params=pltpu.CompilerParams(
            dimension_semantics=("parallel", "parallel"),
            vmem_limit_bytes=48 * 1024 * 1024),
        cost_estimate=pl.CostEstimate(
            flops=2 * n_grp * inner_p * (f * HIDDEN + HIDDEN * HIDDEN + HIDDEN * f),
            transcendentals=2 * n_grp * inner_p * HIDDEN,
            bytes_accessed=int(n_grp * gf * cols * (2 + 4) + n_grp * gh * 4
                               + (gh * gf + gh * gh + gf * gh) * 2)),
    )(xp, b1_tab, kp["w1p"], kp["w2p"], kp["b2p"], kp["w3p"], kp["b3p"])

    # ---- unpack back to the caller's natural (..., FEATURES) layout ----
    y = jnp.transpose(out_p.reshape(n_grp, groups, f, cols), (0, 1, 3, 2))
    y = y.reshape(n_grp, inner_p, f)[:, :inner]
    return y.reshape(batch_shape + (f,))


def score_unet_reference(p, x, t):
    """Pure-JAX f32 reference mirroring the PyTorch forward (for verification)."""
    batch_shape = jnp.broadcast_shapes(x.shape[:-1], jnp.shape(t))
    xb = jnp.broadcast_to(x, batch_shape + (FEATURES,))
    tb = jnp.broadcast_to(jnp.asarray(t, jnp.float32), batch_shape)[..., None]
    ang = tb * p["freqs"].reshape(-1)
    feats = jnp.concatenate([jnp.cos(ang), jnp.sin(ang)], axis=-1)
    h = jax.nn.silu(feats @ p["w1"] + p["b1"][0])
    temb = h @ p["w2"] + p["b2"][0]
    xt = jnp.concatenate([xb, temb], axis=-1)
    h1 = jax.nn.silu(xt @ p["wn1"] + p["bn1"][0])
    h2 = jax.nn.silu(h1 @ p["wn2"] + p["bn2"][0])
    return h2 @ p["wn3"] + p["bn3"][0]


if __name__ == "__main__":
    key = jax.random.PRNGKey(0)
    kp_key, kx1, kt1, kx2, kt2, kx3, kt3, kx4 = jax.random.split(key, 8)
    params = init_params(kp_key)
    kparams = pack_kernel_params(params)
    fwd = jax.jit(score_unet_forward, static_argnames=("chunk_cols",))

    # 1) small: t (2,1) broadcasts over the sequence axis (2 t-groups of 8 rows).
    x1 = jax.random.normal(kx1, (2, 8, FEATURES), jnp.float32)
    t1 = jax.random.uniform(kt1, (2, 1), jnp.float32)
    out1 = jax.block_until_ready(fwd(kparams, x1, t1))
    assert out1.shape == x1.shape
    np.testing.assert_allclose(np.asarray(out1),
                               np.asarray(score_unet_reference(params, x1, t1)),
                               rtol=2e-2, atol=2e-2)

    # 2) multi-chunk 2-D grid + masked edge blocks (cols=150 with 128-lane chunks).
    x2 = jax.random.normal(kx2, (8, 600, FEATURES), jnp.float32)
    t2 = jax.random.uniform(kt2, (8, 1), jnp.float32)
    out2 = jax.block_until_ready(fwd(kparams, x2, t2, chunk_cols=128))
    assert out2.shape == x2.shape
    np.testing.assert_allclose(np.asarray(out2),
                               np.asarray(score_unet_reference(params, x2, t2)),
                               rtol=2e-2, atol=2e-2)

    # 3) inner size not divisible by GROUPS -> per-group pad path (9 -> 12 rows).
    x3 = jax.random.normal(kx3, (4, 9, FEATURES), jnp.float32)
    t3 = jax.random.uniform(kt3, (4, 1), jnp.float32)
    out3 = jax.block_until_ready(fwd(kparams, x3, t3))
    assert out3.shape == x3.shape
    np.testing.assert_allclose(np.asarray(out3),
                               np.asarray(score_unet_reference(params, x3, t3)),
                               rtol=2e-2, atol=2e-2)

    # 4) scalar t -> a single time group covering the whole flattened batch.
    x4 = jax.random.normal(kx4, (3, 5, 8, FEATURES), jnp.float32)
    out4 = jax.block_until_ready(fwd(kparams, x4, 0.7))
    assert out4.shape == x4.shape
    np.testing.assert_allclose(np.asarray(out4),
                               np.asarray(score_unet_reference(params, x4, 0.7)),
                               rtol=2e-2, atol=2e-2)

    print("KERNEL_OK")
</pallas_src>

<mosaic_0001>
module attributes {stable_mosaic.version = 11 : i64} {
  func.func @_temb_bias_kernel(%arg0: i32, %arg1: memref<8x1xf32, #tpu.memory_space<vmem>>, %arg2: memref<1x32xf32, #tpu.memory_space<vmem>>, %arg3: memref<32x256xf32, #tpu.memory_space<vmem>>, %arg4: memref<32x256xf32, #tpu.memory_space<vmem>>, %arg5: memref<1x256xf32, #tpu.memory_space<vmem>>, %arg6: memref<256x16xf32, #tpu.memory_space<vmem>>, %arg7: memref<1x16xf32, #tpu.memory_space<vmem>>, %arg8: memref<16x64xf32, #tpu.memory_space<vmem>>, %arg9: memref<1x64xf32, #tpu.memory_space<vmem>>, %arg10: memref<8x64xf32, #tpu.memory_space<vmem>>) attributes {dimension_semantics = [#tpu.dimension_semantics<parallel>], iteration_bounds = array<i64: 1>, scalar_prefetch = 0 : i64, scratch_operands = 0 : i64, tpu.core_type = #tpu.core_type<tc>, window_params = [{transform_indices = @transform_0, window_bounds = array<i64: 8, 1>}, {pipeline_mode = #tpu.pipeline_mode<synchronous>, transform_indices = @transform_1, window_bounds = array<i64: 1, 32>}, {pipeline_mode = #tpu.pipeline_mode<synchronous>, transform_indices = @transform_2, window_bounds = array<i64: 32, 256>}, {pipeline_mode = #tpu.pipeline_mode<synchronous>, transform_indices = @transform_3, window_bounds = array<i64: 32, 256>}, {pipeline_mode = #tpu.pipeline_mode<synchronous>, transform_indices = @transform_4, window_bounds = array<i64: 1, 256>}, {pipeline_mode = #tpu.pipeline_mode<synchronous>, transform_indices = @transform_5, window_bounds = array<i64: 256, 16>}, {pipeline_mode = #tpu.pipeline_mode<synchronous>, transform_indices = @transform_6, window_bounds = array<i64: 1, 16>}, {pipeline_mode = #tpu.pipeline_mode<synchronous>, transform_indices = @transform_7, window_bounds = array<i64: 16, 64>}, {pipeline_mode = #tpu.pipeline_mode<synchronous>, transform_indices = @transform_8, window_bounds = array<i64: 1, 64>}, {transform_indices = @transform_9, window_bounds = array<i64: 8, 64>}]} {
    %c0 = arith.constant 0 : index
    %c0_0 = arith.constant 0 : index
    %0 = vector.load %arg1[%c0, %c0_0] : memref<8x1xf32, #tpu.memory_space<vmem>>, vector<8x1xf32>
    %c0_1 = arith.constant 0 : index
    %c0_2 = arith.constant 0 : index
    %1 = vector.load %arg2[%c0_1, %c0_2] : memref<1x32xf32, #tpu.memory_space<vmem>>, vector<1x32xf32>
    %2 = vector.broadcast %0 : vector<8x1xf32> to vector<8x32xf32>
    %3 = vector.broadcast %1 : vector<1x32xf32> to vector<8x32xf32>
    %4 = arith.mulf %2, %3 : vector<8x32xf32>
    %5 = math.cos %4 : vector<8x32xf32>
    %c0_3 = arith.constant 0 : index
    %c0_4 = arith.constant 0 : index
    %6 = vector.load %arg3[%c0_3, %c0_4] : memref<32x256xf32, #tpu.memory_space<vmem>>, vector<32x256xf32>
    %cst = arith.constant dense<0.000000e+00> : vector<8x256xf32>
    %7 = tpu.matmul %5, %6, %cst {dimension_numbers = #tpu.dot_dimension_numbers<[1], [0], [0], [1], [0, 0, 1, 1], [], []>} : vector<8x32xf32>, vector<32x256xf32>, vector<8x256xf32> -> vector<8x256xf32>
    %8 = math.sin %4 : vector<8x32xf32>
    %c0_5 = arith.constant 0 : index
    %c0_6 = arith.constant 0 : index
    %9 = vector.load %arg4[%c0_5, %c0_6] : memref<32x256xf32, #tpu.memory_space<vmem>>, vector<32x256xf32>
    %cst_7 = arith.constant dense<0.000000e+00> : vector<8x256xf32>
    %10 = tpu.matmul %8, %9, %cst_7 {dimension_numbers = #tpu.dot_dimension_numbers<[1], [0], [0], [1], [0, 0, 1, 1], [], []>} : vector<8x32xf32>, vector<32x256xf32>, vector<8x256xf32> -> vector<8x256xf32>
    %11 = arith.addf %7, %10 : vector<8x256xf32>
    %c0_8 = arith.constant 0 : index
    %c0_9 = arith.constant 0 : index
    %12 = vector.load %arg5[%c0_8, %c0_9] : memref<1x256xf32, #tpu.memory_space<vmem>>, vector<1x256xf32>
    %13 = vector.broadcast %12 : vector<1x256xf32> to vector<8x256xf32>
    %14 = arith.addf %11, %13 : vector<8x256xf32>
    %cst_10 = arith.constant 5.000000e-01 : f32
    %15 = vector.broadcast %cst_10 : f32 to vector<8x256xf32>
    %16 = arith.mulf %15, %14 : vector<8x256xf32>
    %cst_11 = arith.constant 5.000000e-01 : f32
    %17 = vector.broadcast %cst_11 : f32 to vector<8x256xf32>
    %18 = arith.mulf %17, %14 : vector<8x256xf32>
    %19 = math.tanh %18 : vector<8x256xf32>
    %cst_12 = arith.constant 1.000000e+00 : f32
    %20 = vector.broadcast %cst_12 : f32 to vector<8x256xf32>
    %21 = arith.addf %20, %19 : vector<8x256xf32>
    %22 = arith.mulf %16, %21 : vector<8x256xf32>
    %c0_13 = arith.constant 0 : index
    %c0_14 = arith.constant 0 : index
    %23 = vector.load %arg6[%c0_13, %c0_14] : memref<256x16xf32, #tpu.memory_space<vmem>>, vector<256x16xf32>
    %cst_15 = arith.constant dense<0.000000e+00> : vector<8x16xf32>
    %24 = tpu.matmul %22, %23, %cst_15 {dimension_numbers = #tpu.dot_dimension_numbers<[1], [0], [0], [1], [0, 0, 1, 1], [], []>} : vector<8x256xf32>, vector<256x16xf32>, vector<8x16xf32> -> vector<8x16xf32>
    %c0_16 = arith.constant 0 : index
    %c0_17 = arith.constant 0 : index
    %25 = vector.load %arg7[%c0_16, %c0_17] : memref<1x16xf32, #tpu.memory_space<vmem>>, vector<1x16xf32>
    %26 = vector.broadcast %25 : vector<1x16xf32> to vector<8x16xf32>
    %27 = arith.addf %24, %26 : vector<8x16xf32>
    %c0_18 = arith.constant 0 : index
    %c0_19 = arith.constant 0 : index
    %28 = vector.load %arg8[%c0_18, %c0_19] : memref<16x64xf32, #tpu.memory_space<vmem>>, vector<16x64xf32>
    %cst_20 = arith.constant dense<0.000000e+00> : vector<8x64xf32>
    %29 = tpu.matmul %27, %28, %cst_20 {dimension_numbers = #tpu.dot_dimension_numbers<[1], [0], [0], [1], [0, 0, 1, 1], [], []>} : vector<8x16xf32>, vector<16x64xf32>, vector<8x64xf32> -> vector<8x64xf32>
    %c0_21 = arith.constant 0 : index
    %c0_22 = arith.constant 0 : index
    %30 = vector.load %arg9[%c0_21, %c0_22] : memref<1x64xf32, #tpu.memory_space<vmem>>, vector<1x64xf32>
    %31 = vector.broadcast %30 : vector<1x64xf32> to vector<8x64xf32>
    %32 = arith.addf %29, %31 : vector<8x64xf32>
    %c0_23 = arith.constant 0 : index
    %c0_24 = arith.constant 0 : index
    %33 = vector.load %arg10[%c0_23, %c0_24] : memref<8x64xf32, #tpu.memory_space<vmem>>, vector<8x64xf32>
    tpu.vector_store %arg10[%c0_23, %c0_24], %32 {strides = array<i32>} : memref<8x64xf32, #tpu.memory_space<vmem>>, vector<8x64xf32>,
    return
  }
  func.func @transform_0(%arg0: i32) -> (i32, i32) {
    %c0_i32 = arith.constant 0 : i32
    %c0_i32_0 = arith.constant 0 : i32
    return %arg0, %c0_i32 : i32, i32
  }
  func.func @transform_1(%arg0: i32) -> (i32, i32) {
    %c0_i32 = arith.constant 0 : i32
    %c0_i32_0 = arith.constant 0 : i32
    %c0_i32_1 = arith.constant 0 : i32
    return %c0_i32, %c0_i32_0 : i32, i32
  }
  func.func @transform_2(%arg0: i32) -> (i32, i32) {
    %c0_i32 = arith.constant 0 : i32
    %c0_i32_0 = arith.constant 0 : i32
    %c0_i32_1 = arith.constant 0 : i32
    return %c0_i32, %c0_i32_0 : i32, i32
  }
  func.func @transform_3(%arg0: i32) -> (i32, i32) {
    %c0_i32 = arith.constant 0 : i32
    %c0_i32_0 = arith.constant 0 : i32
    %c0_i32_1 = arith.constant 0 : i32
    return %c0_i32, %c0_i32_0 : i32, i32
  }
  func.func @transform_4(%arg0: i32) -> (i32, i32) {
    %c0_i32 = arith.constant 0 : i32
    %c0_i32_0 = arith.constant 0 : i32
    %c0_i32_1 = arith.constant 0 : i32
    return %c0_i32, %c0_i32_0 : i32, i32
  }
  func.func @transform_5(%arg0: i32) -> (i32, i32) {
    %c0_i32 = arith.constant 0 : i32
    %c0_i32_0 = arith.constant 0 : i32
    %c0_i32_1 = arith.constant 0 : i32
    return %c0_i32, %c0_i32_0 : i32, i32
  }
  func.func @transform_6(%arg0: i32) -> (i32, i32) {
    %c0_i32 = arith.constant 0 : i32
    %c0_i32_0 = arith.constant 0 : i32
    %c0_i32_1 = arith.constant 0 : i32
    return %c0_i32, %c0_i32_0 : i32, i32
  }
  func.func @transform_7(%arg0: i32) -> (i32, i32) {
    %c0_i32 = arith.constant 0 : i32
    %c0_i32_0 = arith.constant 0 : i32
    %c0_i32_1 = arith.constant 0 : i32
    return %c0_i32, %c0_i32_0 : i32, i32
  }
  func.func @transform_8(%arg0: i32) -> (i32, i32) {
    %c0_i32 = arith.constant 0 : i32
    %c0_i32_0 = arith.constant 0 : i32
    %c0_i32_1 = arith.constant 0 : i32
    return %c0_i32, %c0_i32_0 : i32, i32
  }
  func.func @transform_9(%arg0: i32) -> (i32, i32) {
    %c0_i32 = arith.constant 0 : i32
    %c0_i32_0 = arith.constant 0 : i32
    return %arg0, %c0_i32 : i32, i32
  }
}

module attributes {stable_mosaic.version = 11 : i64} {
  func.func @_packed_mlp_kernel(%arg0: i32, %arg1: i32, %arg2: memref<1x16x2xbf16, #tpu.memory_space<vmem>>, %arg3: memref<1x256x1xf32, #tpu.memory_space<vmem>>, %arg4: memref<256x16xbf16, #tpu.memory_space<vmem>>, %arg5: memref<256x256xbf16, #tpu.memory_space<vmem>>, %arg6: memref<256x1xf32, #tpu.memory_space<vmem>>, %arg7: memref<16x256xbf16, #tpu.memory_space<vmem>>, %arg8: memref<16x1xf32, #tpu.memory_space<vmem>>, %arg9: memref<1x16x2xf32, #tpu.memory_space<vmem>>) attributes {dimension_semantics = [#tpu.dimension_semantics<parallel>, #tpu.dimension_semantics<parallel>], iteration_bounds = array<i64: 2, 1>, scalar_prefetch = 0 : i64, scratch_operands = 0 : i64, tpu.core_type = #tpu.core_type<tc>, window_params = [{transform_indices = @transform_0, window_bounds = array<i64: 1, 16, 2>}, {transform_indices = @transform_1, window_bounds = array<i64: 1, 256, 1>}, {pipeline_mode = #tpu.pipeline_mode<synchronous>, transform_indices = @transform_2, window_bounds = array<i64: 256, 16>}, {pipeline_mode = #tpu.pipeline_mode<synchronous>, transform_indices = @transform_3, window_bounds = array<i64: 256, 256>}, {pipeline_mode = #tpu.pipeline_mode<synchronous>, transform_indices = @transform_4, window_bounds = array<i64: 256, 1>}, {pipeline_mode = #tpu.pipeline_mode<synchronous>, transform_indices = @transform_5, window_bounds = array<i64: 16, 256>}, {pipeline_mode = #tpu.pipeline_mode<synchronous>, transform_indices = @transform_6, window_bounds = array<i64: 16, 1>}, {transform_indices = @transform_7, window_bounds = array<i64: 1, 16, 2>}]} {
    %c0 = arith.constant 0 : index
    %c0_0 = arith.constant 0 : index
    %c0_1 = arith.constant 0 : index
    %0 = vector.load %arg2[%c0, %c0_0, %c0_1] : memref<1x16x2xbf16, #tpu.memory_space<vmem>>, vector<1x16x2xbf16>
    %1 = vector.shape_cast %0 : vector<1x16x2xbf16> to vector<16x2xbf16>
    %c0_2 = arith.constant 0 : index
    %c0_3 = arith.constant 0 : index
    %2 = vector.load %arg4[%c0_2, %c0_3] : memref<256x16xbf16, #tpu.memory_space<vmem>>, vector<256x16xbf16>
    %cst = arith.constant dense<0.000000e+00> : vector<256x2xf32>
    %3 = tpu.matmul %2, %1, %cst {dimension_numbers = #tpu.dot_dimension_numbers<[1], [0], [0], [1], [0, 0, 1, 1], [], []>} : vector<256x16xbf16>, vector<16x2xbf16>, vector<256x2xf32> -> vector<256x2xf32>
    %c0_4 = arith.constant 0 : index
    %c0_5 = arith.constant 0 : index
    %c0_6 = arith.constant 0 : index
    %4 = vector.load %arg3[%c0_4, %c0_5, %c0_6] : memref<1x256x1xf32, #tpu.memory_space<vmem>>, vector<1x256x1xf32>
    %5 = vector.shape_cast %4 : vector<1x256x1xf32> to vector<256x1xf32>
    %6 = vector.broadcast %5 : vector<256x1xf32> to vector<256x2xf32>
    %7 = arith.addf %3, %6 : vector<256x2xf32>
    %cst_7 = arith.constant 5.000000e-01 : f32
    %8 = vector.broadcast %cst_7 : f32 to vector<256x2xf32>
    %9 = arith.mulf %8, %7 : vector<256x2xf32>
    %cst_8 = arith.constant 5.000000e-01 : f32
    %10 = vector.broadcast %cst_8 : f32 to vector<256x2xf32>
    %11 = arith.mulf %10, %7 : vector<256x2xf32>
    %12 = math.tanh %11 : vector<256x2xf32>
    %cst_9 = arith.constant 1.000000e+00 : f32
    %13 = vector.broadcast %cst_9 : f32 to vector<256x2xf32>
    %14 = arith.addf %13, %12 : vector<256x2xf32>
    %15 = arith.mulf %9, %14 : vector<256x2xf32>
    %16 = arith.truncf %15 : vector<256x2xf32> to vector<256x2xbf16>
    %c0_10 = arith.constant 0 : index
    %c0_11 = arith.constant 0 : index
    %17 = vector.load %arg5[%c0_10, %c0_11] : memref<256x256xbf16, #tpu.memory_space<vmem>>, vector<256x256xbf16>
    %cst_12 = arith.constant dense<0.000000e+00> : vector<256x2xf32>
    %18 = tpu.matmul %17, %16, %cst_12 {dimension_numbers = #tpu.dot_dimension_numbers<[1], [0], [0], [1], [0, 0, 1, 1], [], []>} : vector<256x256xbf16>, vector<256x2xbf16>, vector<256x2xf32> -> vector<256x2xf32>
    %c0_13 = arith.constant 0 : index
    %c0_14 = arith.constant 0 : index
    %19 = vector.load %arg6[%c0_13, %c0_14] : memref<256x1xf32, #tpu.memory_space<vmem>>, vector<256x1xf32>
    %20 = vector.broadcast %19 : vector<256x1xf32> to vector<256x2xf32>
    %21 = arith.addf %18, %20 : vector<256x2xf32>
    %cst_15 = arith.constant 5.000000e-01 : f32
    %22 = vector.broadcast %cst_15 : f32 to vector<256x2xf32>
    %23 = arith.mulf %22, %21 : vector<256x2xf32>
    %cst_16 = arith.constant 5.000000e-01 : f32
    %24 = vector.broadcast %cst_16 : f32 to vector<256x2xf32>
    %25 = arith.mulf %24, %21 : vector<256x2xf32>
    %26 = math.tanh %25 : vector<256x2xf32>
    %cst_17 = arith.constant 1.000000e+00 : f32
    %27 = vector.broadcast %cst_17 : f32 to vector<256x2xf32>
    %28 = arith.addf %27, %26 : vector<256x2xf32>
    %29 = arith.mulf %23, %28 : vector<256x2xf32>
    %30 = arith.truncf %29 : vector<256x2xf32> to vector<256x2xbf16>
    %c0_18 = arith.constant 0 : index
    %c0_19 = arith.constant 0 : index
    %31 = vector.load %arg7[%c0_18, %c0_19] : memref<16x256xbf16, #tpu.memory_space<vmem>>, vector<16x256xbf16>
    %cst_20 = arith.constant dense<0.000000e+00> : vector<16x2xf32>
    %32 = tpu.matmul %31, %30, %cst_20 {dimension_numbers = #tpu.dot_dimension_numbers<[1], [0], [0], [1], [0, 0, 1, 1], [], []>} : vector<16x256xbf16>, vector<256x2xbf16>, vector<16x2xf32> -> vector<16x2xf32>
    %c0_21 = arith.constant 0 : index
    %c0_22 = arith.constant 0 : index
    %33 = vector.load %arg8[%c0_21, %c0_22] : memref<16x1xf32, #tpu.memory_space<vmem>>, vector<16x1xf32>
    %34 = vector.broadcast %33 : vector<16x1xf32> to vector<16x2xf32>
    %35 = arith.addf %32, %34 : vector<16x2xf32>
    %c0_23 = arith.constant 0 : index
    %c0_24 = arith.constant 0 : index
    %c0_25 = arith.constant 0 : index
    %36 = vector.load %arg9[%c0_23, %c0_24, %c0_25] : memref<1x16x2xf32, #tpu.memory_space<vmem>>, vector<1x16x2xf32>
    %37 = vector.shape_cast %36 : vector<1x16x2xf32> to vector<16x2xf32>
    %38 = vector.shape_cast %35 : vector<16x2xf32> to vector<1x16x2xf32>
    tpu.vector_store %arg9[%c0_23, %c0_24, %c0_25], %38 {strides = array<i32>} : memref<1x16x2xf32, #tpu.memory_space<vmem>>, vector<1x16x2xf32>,
    return
  }
  func.func @transform_0(%arg0: i32, %arg1: i32) -> (i32, i32, i32) {
    %c0_i32 = arith.constant 0 : i32
    %c0_i32_0 = arith.constant 0 : i32
    return %arg0, %c0_i32, %arg1 : i32, i32, i32
  }
  func.func @transform_1(%arg0: i32, %arg1: i32) -> (i32, i32, i32) {
    %c0_i32 = arith.constant 0 : i32
    %c0_i32_0 = arith.constant 0 : i32
    %c0_i32_1 = arith.constant 0 : i32
    return %arg0, %c0_i32, %c0_i32_0 : i32, i32, i32
  }
  func.func @transform_2(%arg0: i32, %arg1: i32) -> (i32, i32) {
    %c0_i32 = arith.constant 0 : i32
    %c0_i32_0 = arith.constant 0 : i32
    %c0_i32_1 = arith.constant 0 : i32
    return %c0_i32, %c0_i32_0 : i32, i32
  }
  func.func @transform_3(%arg0: i32, %arg1: i32) -> (i32, i32) {
    %c0_i32 = arith.constant 0 : i32
    %c0_i32_0 = arith.constant 0 : i32
    %c0_i32_1 = arith.constant 0 : i32
    return %c0_i32, %c0_i32_0 : i32, i32
  }
  func.func @transform_4(%arg0: i32, %arg1: i32) -> (i32, i32) {
    %c0_i32 = arith.constant 0 : i32
    %c0_i32_0 = arith.constant 0 : i32
    %c0_i32_1 = arith.constant 0 : i32
    return %c0_i32, %c0_i32_0 : i32, i32
  }
  func.func @transform_5(%arg0: i32, %arg1: i32) -> (i32, i32) {
    %c0_i32 = arith.constant 0 : i32
    %c0_i32_0 = arith.constant 0 : i32
    %c0_i32_1 = arith.constant 0 : i32
    return %c0_i32, %c0_i32_0 : i32, i32
  }
  func.func @transform_6(%arg0: i32, %arg1: i32) -> (i32, i32) {
    %c0_i32 = arith.constant 0 : i32
    %c0_i32_0 = arith.constant 0 : i32
    %c0_i32_1 = arith.constant 0 : i32
    return %c0_i32, %c0_i32_0 : i32, i32
  }
  func.func @transform_7(%arg0: i32, %arg1: i32) -> (i32, i32, i32) {
    %c0_i32 = arith.constant 0 : i32
    %c0_i32_0 = arith.constant 0 : i32
    return %arg0, %c0_i32, %arg1 : i32, i32, i32
  }
}

</mosaic_0001>

<bundles_post_ra>
// kernel: score_unet_forward.2
= control target key start
LH: loop header
LB: loop body
LE: loop exit
PB: predicated region body
PF: predicated region fallthrough
CT: control target
= control target key end

     0   :  { %v719_v0 = vmov 0   ;;  %v720_v5 = vmov 0.0   ;;  %v721_v25 = vmov 683565275   ;;  %v722_v27 = vmov 2475754826   ;;  %s978_s0 = inlined_call_operand.vmem [shape: f32[8,1], index: 0, kind: input, shape index: {}]   ;;  %s979_s3 = inlined_call_operand.vmem [shape: f32[32,256], index: 3, kind: input, shape index: {}]   ;;  %s980_s2 = inlined_call_operand.vmem [shape: f32[32,256], index: 2, kind: input, shape index: {}]   ;;  %s981_s1 = inlined_call_operand.vmem [shape: f32[1,32], index: 1, kind: input, shape index: {}]   ;;  %s982_s5 = inlined_call_operand.vmem [shape: f32[256,16], index: 5, kind: input, shape index: {}]   ;;  %s983_s4 = inlined_call_operand.vmem [shape: f32[1,256], index: 4, kind: input, shape index: {}]   ;;  %s984_s7 = inlined_call_operand.vmem [shape: f32[16,64], index: 7, kind: input, shape index: {}]   ;;  %s985_s6 = inlined_call_operand.vmem [shape: f32[1,16], index: 6, kind: input, shape index: {}]   ;;  %s986_s8 = inlined_call_operand.vmem [shape: f32[1,64], index: 8, kind: input, shape index: {}]   ;;  %s987_s9 = inlined_call_operand.vmem [shape: f32[8,64], index: 9, kind: output, shape index: {}]  }
   0x1   :  { %710 = vset.pattern.permute.xlu0 %v719_v0  ;;  %v32_v1 = vld [vmem:[%s978_s0] sm:$0xff]  ;;  %v268_v2 = vld [vmem:[%s979_s3 + $0x38] sm:$0xff]  ;;  %v267_v3 = vld [vmem:[%s979_s3 + $0x30] sm:$0xff]  ;;  %337 = vmatprep.mubr.f32.mxu1 %v720_v5  ;;  %v723_v30 = vmov 2131351028   ;;  %vm269_vm12 = vcmask 261120  }
   0x2   :  { %36 = vperm.xlu0 %710, %v32_v1   ;;  %v266_v4 = vld [vmem:[%s979_s3 + $0x28] sm:$0xff]  ;;  %297 = vmatprep.subr.mxu1 %v268_v2  ;;  %v265_v6 = vld [vmem:[%s979_s3 + $0x20] sm:$0xff]  ;;  %v264_v7 = vld [vmem:[%s979_s3 + $0x18] sm:$0xff]  ;;  %v724_v33 = vmov 2102212464  }
   0x3   :  { %298 = vmatpush1.msra.mxu1 %v267_v3  ;;  %v263_v8 = vld [vmem:[%s979_s3 + $0x10] sm:$0xff]  ;;  %v262_v9 = vld [vmem:[%s979_s3 + $0x8] sm:$0xff]  ;;  %v261_v10 = vld [vmem:[%s979_s3] sm:$0xff]  ;;  %v725_v36 = vmov 920167782  }
   0x4   :  { %299 = vmatprep.subr.mxu1 %v266_v4  ;;  %v156_v11 = vld [vmem:[%s980_s2 + $0x38] sm:$0xff]  ;;  %v638_v12 = vld [vmem:[%s981_s1] ss:$0 sm:$0xff]  ;;  %v726_v39 = vmov 1326507024  }
   0x5   :  { %300 = vmatpush1.msra.mxu1 %v265_v6 }
   0x6   :  { %301 = vmatprep.subr.mxu1 %v264_v7 }
   0x7   :  { %302 = vmatpush1.msra.mxu1 %v263_v8 }
   0x8   :  { %303 = vmatprep.subr.mxu1 %v262_v9 }
   0x9   :  { %304 = vmatpush1.msra.mxu1 %v261_v10 }
   0xa   :  { %371 = vmatprep.subr.mxu1 %v156_v11 }
  0x7d   :  { %v37_v13 = vpop.permute.xlu0 %36 }
  0x7e   :  { %v812_v14 = vmul.f32 %v638_v12, %v37_v13 }
  0x80   :  { %v49_v15 = vand.u32 2139095040, %v812_v14  ;;  %v46_v19 = vand.u32 2147483647, %v812_v14  ;;  %vm48_vm7 = vcmp.lt.s32.totalorder %v812_v14, 0  ;;  %vm138_vm13 = vweird.f32 %v812_v14 }
  0x82   :  { %v50_v16 = vshrl.u32 %v49_v15, 23  ;;  %v53_v22 = vand.u32 8388607, %v46_v19  ;;  %vm47_vm8 = vcmp.le.f32.partialorder %v46_v19, 0.7853982 }
  0x84   :  { %v639_v17 = vadd.s32 4294967169, %v50_v16  ;;  %v54_v41 = vor.u32 8388608, %v53_v22 }
  0x86   :  { %v56_v18 = vadd.s32 1, %v639_v17  ;;  %v94_v55 = vshll.u32 %v54_v41, 8 }
  0x88   :  { %vm57_vm0 = vcmp.gt.s32.totalorder %v56_v18, 0 }
  0x89   :  { %v58_v20 = vsel %vm57_vm0, %v56_v18, 0 }
  0x8a   :  { %v60_v21 = vand.u32 31, %v58_v20  ;;  %v59_v24 = vshrl.u32 %v58_v20, 5 }
  0x8c   :  { %v61_v23 = vsub.s32 32, %v60_v21  ;;  %v63_v26 = vshll.u32 %v721_v25, %v60_v21  ;;  %v66_v28 = vshll.u32 %v722_v27, %v60_v21  ;;  %v69_v32 = vshll.u32 %v723_v30, %v60_v21 }
  0x8d   :  { %v72_v35 = vshll.u32 %v724_v33, %v60_v21  ;;  %v75_v38 = vshll.u32 %v725_v36, %v60_v21  ;;  %vm78_vm1 = vcmp.lt.s32.totalorder %v59_v24, 1  ;;  %vm81_vm2 = vcmp.lt.s32.totalorder %v59_v24, 4 }
  0x8e   :  { %v64_v29 = vshrl.u32 %v722_v27, %v61_v23  ;;  %v67_v31 = vshrl.u32 %v723_v30, %v61_v23  ;;  %v70_v34 = vshrl.u32 %v724_v33, %v61_v23  ;;  %v73_v37 = vshrl.u32 %v725_v36, %v61_v23 }
  0x8f   :  { %v76_v40 = vshrl.u32 %v726_v39, %v61_v23  ;;  %v62_v50 = vshrl.u32 %v721_v25, %v61_v23  ;;  %vm80_vm3 = vcmp.lt.s32.totalorder %v59_v24, 3  ;;  %vm79_vm4 = vcmp.lt.s32.totalorder %v59_v24, 2 }
  0x90   :  { %v65_v42 = vor.u32 %v64_v29, %v63_v26  ;;  %v68_v43 = vor.u32 %v67_v31, %v66_v28  ;;  %v71_v44 = vor.u32 %v70_v34, %v69_v32  ;;  %v74_v45 = vor.u32 %v73_v37, %v72_v35 }
  0x91   :  { %v77_v46 = vor.u32 %v76_v40, %v75_v38 }
  0x92   :  { %v83_v47 = vsel %vm81_vm2, %v71_v44, 2102212464  ;;  %v86_v48 = vsel %vm78_vm1, %v65_v42, %v68_v43  ;;  %v90_v49 = vsel %vm78_vm1, %v68_v43, %v71_v44  ;;  %v87_v51 = vsel %vm81_vm2, %v74_v45, 920167782 }
  0x93   :  { %v91_v52 = vsel %vm81_vm2, %v77_v46, 1326507024  ;;  %v88_v53 = vsel %vm80_vm3, %v71_v44, %v87_v51  ;;  %v82_v56 = vsel %vm78_vm1, %v62_v50, %v65_v42  ;;  %v84_v57 = vsel %vm80_vm3, %v68_v43, %v83_v47  ;;  %v155_v44 = vld [vmem:[%s980_s2 + $0x30] sm:$0xff]  ;;  %v154_v46 = vld [vmem:[%s980_s2 + $0x28] sm:$0xff]  ;;  %v153_v47 = vld [vmem:[%s980_s2 + $0x20] sm:$0xff] }
  0x94   :  { %v92_v54 = vsel %vm80_vm3, %v74_v45, %v91_v52  ;;  %v89_v58 = vsel %vm79_vm4, %v86_v48, %v88_v53  ;;  %v85_v0 = vsel %vm79_vm4, %v82_v56, %v84_v57  ;;  %v152_v50 = vld [vmem:[%s980_s2 + $0x18] sm:$0xff]  ;;  %v151_v51 = vld [vmem:[%s980_s2 + $0x10] sm:$0xff]  ;;  %v150_v52 = vld [vmem:[%s980_s2 + $0x8] sm:$0xff]  ;;  %vm727_vm1 = vmmov 0  }
  0x95   :  { %v93_v59 = vsel %vm79_vm4, %v90_v49, %v92_v54  ;;  %v821_v62 = vmul.u32.u64.low %v94_v55, %v89_v58  ;;  %v822_v63 = vmul.u32.u64.high %v94_v55, %v89_v58, %v821_v62  ;;  %v101_v2 = vmul.u32 %v94_v55, %v85_v0  ;;  %v149_v54 = vld [vmem:[%s980_s2] sm:$0xff]  ;;  %v471_v56 = vld [vmem:[%s982_s5 + $0xf8] sm:$0xff]  ;;  %v470_v58 = vld [vmem:[%s982_s5 + $0xf0] sm:$0xff] }
  0x96   :  { %v818_v60 = vmul.u32.u64.low %v94_v55, %v93_v59  ;;  %v819_v61 = vmul.u32.u64.high %v94_v55, %v93_v59, %v818_v60  ;;  %v455_v57 = vld [vmem:[%s982_s5 + $0x78] sm:$0xff]  ;;  %652 = vmatprep.subr.mxu0 %v471_v56  ;;  %v469_v59 = vld [vmem:[%s982_s5 + $0xe8] sm:$0xff]  ;;  %vm558_vm2 = vcmask 130048   ;;  %vm632_vm3 = vcmask 523264  }
  0x97   :  { %v104_v1 = vadd.s32 1, %v822_v63  ;;  %653 = vmatpush3.msra.mxu0 %v455_v57  ;;  %v453_v60 = vld [vmem:[%s982_s5 + $0x68] sm:$0xff]  ;;  %v451_v0 = vld [vmem:[%s982_s5 + $0x58] sm:$0xff] }
  0x98   :  { %vm103_vm5 = vc.u32 %v819_v61, %v821_v62  ;;  %v102_v16 = vadd.s32 %v821_v62, %v819_v61  ;;  %654 = vmatprep.subr.mxu0 %v470_v58  ;;  %v468_v61 = vld [vmem:[%s982_s5 + $0xe0] sm:$0xff] }
  0x99   :  { %v105_v3 = vsel %vm103_vm5, %v104_v1, %v822_v63  ;;  %v452_v62 = vld [vmem:[%s982_s5 + $0x60] sm:$0xff]  ;;  %v467_v63 = vld [vmem:[%s982_s5 + $0xd8] sm:$0xff]  ;;  %v466_v1 = vld [vmem:[%s982_s5 + $0xd0] sm:$0xff] }
  0x9a   :  { %v106_v4 = vadd.s32 %v105_v3, %v101_v2  ;;  %v450_v2 = vld [vmem:[%s982_s5 + $0x50] sm:$0xff]  ;;  %v465_v3 = vld [vmem:[%s982_s5 + $0xc8] sm:$0xff] }
  0x9c   :  { %v107_v6 = vadd.s32 536870912, %v106_v4 }
  0x9e   :  { %v108_v7 = vshrl.u32 %v107_v6, 30  ;;  %v464_v6 = vld [vmem:[%s982_s5 + $0xc0] sm:$0xff] }
  0xa0   :  { %v109_v8 = vshll.u32 %v108_v7, 30  ;;  %v132_v30 = vsub.s32 4, %v108_v7 }
  0xa2   :  { %v110_v9 = vsub.s32 %v106_v4, %v109_v8  ;;  %v133_v33 = vsel %vm48_vm7, %v132_v30, %v108_v7  ;;  %v449_v4 = vld [vmem:[%s982_s5 + $0x48] sm:$0xff]  ;;  %v448_v7 = vld [vmem:[%s982_s5 + $0x40] sm:$0xff]  ;;  %v463_v8 = vld [vmem:[%s982_s5 + $0xb8] sm:$0xff] }
  0xa3   :  { %v135_v34 = vsel %vm47_vm8, 0, %v133_v33  ;;  %v418_v30 = vld [vmem:[%s983_s4] sm:$0x3] }
  0xa4   :  { %v112_v10 = vsub.s32 0, %v110_v9  ;;  %v250_v35 = vadd.s32 3, %v135_v34  ;;  %v139_v41 = vand.u32 3, %v135_v34 }
  0xa6   :  { %v640_v11 = vmin.u32 %v112_v10, %v110_v9  ;;  %v251_v36 = vand.u32 3, %v250_v35  ;;  %vm141_vm14 = vcmp.eq.s32.totalorder %v139_v41, 0  ;;  %vm144_vm15 = vcmp.eq.s32.totalorder %v139_v41, 2  ;;  %v462_v10 = vld [vmem:[%s982_s5 + $0xb0] sm:$0xff] }
  0xa7   :  { %vm140_vm0 = vcmp.lt.s32.totalorder %v139_v41, 2 }
  0xa8   :  { %v114_v12 = vclz %v640_v11  ;;  %vm256_vm9 = vcmp.eq.s32.totalorder %v251_v36, 2  ;;  %vm253_vm10 = vcmp.eq.s32.totalorder %v251_v36, 0  ;;  %vm252_vm11 = vcmp.lt.s32.totalorder %v251_v36, 2  ;;  %v446_v11 = vld [vmem:[%s982_s5 + $0x30] sm:$0xff] }
  0xaa   :  { %v641_v13 = vadd.s32 4294967294, %v114_v12  ;;  %v461_v12 = vld [vmem:[%s982_s5 + $0xa8] sm:$0xff] }
  0xac   :  { %vm642_vm6 = vcmp.lt.s32.totalorder %v641_v13, 0 }
  0xad   :  { %v117_v15 = vsel %vm642_vm6, 0, %v641_v13  ;;  %v445_v13 = vld [vmem:[%s982_s5 + $0x28] sm:$0xff] }
  0xae   :  { %v118_v17 = vsub.s32 32, %v117_v15  ;;  %v122_v18 = vsub.s32 4294967266, %v117_v15  ;;  %v119_v20 = vshll.u32 %v110_v9, %v117_v15  ;;  %v447_v9 = vld [vmem:[%s982_s5 + $0x38] sm:$0xff]  ;;  %v460_v15 = vld [vmem:[%s982_s5 + $0xa0] sm:$0xff] }
  0xb0   :  { %v120_v21 = vshrl.u32 %v102_v16, %v118_v17  ;;  %v123_v22 = vadd.s32 127, %v122_v18  ;;  %v444_v16 = vld [vmem:[%s982_s5 + $0x20] sm:$0xff]  ;;  %v459_v17 = vld [vmem:[%s982_s5 + $0x98] sm:$0xff] }
  0xb1   :  { %v443_v18 = vld [vmem:[%s982_s5 + $0x18] sm:$0xff] }
  0xb2   :  { %v121_v23 = vor.u32 %v120_v21, %v119_v20  ;;  %v124_v24 = vshll.u32 %v123_v22, 23  ;;  %v458_v20 = vld [vmem:[%s982_s5 + $0x90] sm:$0xff]  ;;  %v457_v22 = vld [vmem:[%s982_s5 + $0x88] sm:$0xff] }
  0xb3   :  { %v442_v21 = vld [vmem:[%s982_s5 + $0x10] sm:$0xff] }
  0xb4   :  { %v125_v25 = vor.u32 4788187, %v124_v24  ;;  %v128_v27 = vcvt.s32.f32 %v121_v23  ;;  %v441_v23 = vld [vmem:[%s982_s5 + $0x8] sm:$0xff]  ;;  %v456_v24 = vld [vmem:[%s982_s5 + $0x80] sm:$0xff] }
  0xb6   :  { %v126_v26 = vand.u32 2147483647, %v125_v25  ;;  %v440_v25 = vld [vmem:[%s982_s5] sm:$0xff] }
  0xb8   :  { %v129_v28 = vmul.f32 %v128_v27, %v126_v26  ;;  %v420_v26 = vlaneseq }
  0xba   :  { %v130_v29 = vxor.u32 2147483648, %v129_v28  ;;  %v421_v27 = vshrl.u32 %v420_v26, 7 }
  0xbc   :  { %v131_v31 = vsel %vm48_vm7, %v130_v29, %v129_v28  ;;  %v422_v29 = vsub.s32 0, %v421_v27 }
  0xbd   :  { %v134_v32 = vsel %vm47_vm8, %v812_v14, %v131_v31  ;;  %v454_v14 = vld [vmem:[%s982_s5 + $0x70] sm:$0xff]  ;;  %v426_v31 = vsub.s32 1, %v421_v27 }
  0xbe   :  { %711 = vcosq.f32 %v134_v32  ;;  %655 = vmatpush3.msra.mxu0 %v454_v14  ;;  %v423_v33 = vrot.slane %v418_v30, %v422_v29 }
  0xbf   :  { %713 = vsinq.f32 %v134_v32  ;;  %656 = vmatprep.subr.mxu0 %v469_v59  ;;  %v427_v36 = vrot.slane %v418_v30, %v426_v31 }
  0xc0   :  { %657 = vmatpush3.msra.mxu0 %v453_v60 }
  0xc1   :  { %658 = vmatprep.subr.mxu0 %v468_v61 }
  0xc2   :  { %659 = vmatpush3.msra.mxu0 %v452_v62 }
  0xc3   :  { %660 = vmatprep.subr.mxu0 %v467_v63 }
  0xc4   :  { %661 = vmatpush3.msra.mxu0 %v451_v0 }
  0xc5   :  { %662 = vmatprep.subr.mxu0 %v466_v1 }
  0xc6   :  { %663 = vmatpush3.msra.mxu0 %v450_v2 }
  0xc7   :  { %664 = vmatprep.subr.mxu0 %v465_v3 }
  0xc8   :  { %665 = vmatpush3.msra.mxu0 %v449_v4 }
  0xc9   :  { %666 = vmatprep.subr.mxu0 %v464_v6 }
  0xca   :  { %667 = vmatpush3.msra.mxu0 %v448_v7 }
  0xcb   :  { %v712_v37 = vpop.eup %711  ;;  %668 = vmatprep.subr.mxu0 %v463_v8 }
  0xcc   :  { %v714_v38 = vpop.eup %713  ;;  %v145_v39 = vxor.u32 2147483648, %v712_v37  ;;  %669 = vmatpush3.msra.mxu0 %v447_v9 }
  0xcd   :  { %v142_v40 = vxor.u32 2147483648, %v714_v38  ;;  %670 = vmatprep.subr.mxu0 %v462_v10 }
  0xce   :  { %v258_v42 = vsel %vm256_vm9, %v145_v39, %v714_v38  ;;  %v146_v49 = vsel %vm144_vm15, %v145_v39, %v714_v38  ;;  %671 = vmatpush3.msra.mxu0 %v446_v11 }
  0xcf   :  { %v255_v43 = vsel %vm253_vm10, %v712_v37, %v142_v40  ;;  %v143_v48 = vsel %vm141_vm14, %v712_v37, %v142_v40  ;;  %672 = vmatprep.subr.mxu0 %v461_v12 }
  0xd0   :  { %v259_v19 = vsel %vm252_vm11, %v255_v43, %v258_v42  ;;  %v147_v53 = vsel %vm140_vm0, %v143_v48, %v146_v49  ;;  %673 = vmatpush3.msra.mxu0 %v445_v13  ;;  %v550_v48 = vld [vmem:[%s984_s7 + $0x8] sm:$0xff]  ;;  %v549_v49 = vld [vmem:[%s984_s7] sm:$0xff] }
  0xd1   :  { %v260_v45 = vsel %vm138_vm13, nan, %v259_v19  ;;  %v148_v55 = vsel %vm138_vm13, nan, %v147_v53  ;;  %674 = vmatprep.subr.mxu0 %v460_v15 }
  0xd2   :  { %647 = vmatmul.mubr.msk.f32.vlgmr.msra.gmra.mxu1 %vm269_vm12, %v260_v45  ;;  %675 = vmatpush3.msra.mxu0 %v444_v16 }
  0xd3   :  { %372 = vmatpush1.msra.mxu1 %v155_v44  ;;  %411 = vmatprep.mubr.f32.mxu1 %v720_v5 }
  0xd4   :  { %373 = vmatprep.subr.mxu1 %v154_v46  ;;  %676 = vmatprep.subr.mxu0 %v459_v17 }
  0xd5   :  { %374 = vmatpush1.msra.mxu1 %v153_v47  ;;  %677 = vmatpush3.msra.mxu0 %v443_v18 }
  0xd6   :  { %375 = vmatprep.subr.mxu1 %v152_v50  ;;  %678 = vmatprep.subr.mxu0 %v458_v20 }
  0xd7   :  { %376 = vmatpush1.msra.mxu1 %v151_v51  ;;  %679 = vmatpush3.msra.mxu0 %v442_v21  ;;  %v649_v51 = vld [vmem:[%s985_s6] ss:$0 sm:$0xff] }
  0xd8   :  { %377 = vmatprep.subr.mxu1 %v150_v52  ;;  %680 = vmatprep.subr.mxu0 %v457_v22 }
  0xd9   :  { %378 = vmatpush1.msra.mxu1 %v149_v54  ;;  %681 = vmatpush3.msra.mxu0 %v441_v23 }
  0xda   :  { %648 = vmatmul.mubr.msk.f32.vlgmr.msra.gmra.mxu1 %vm269_vm12, %v148_v55  ;;  %690 = vmatprep.subr.mxu1 %v720_v5  ;;  %v650_v55 = vld [vmem:[%s986_s8] ss:$0 sm:$0xff] }
  0xdb   :  { %682 = vmatprep.subr.mxu0 %v456_v24  ;;  %691 = vmatpush3.msra.mxu1 %v550_v48 }
  0xdc   :  { %683 = vmatpush3.msra.mxu0 %v440_v25  ;;  %692 = vmatprep.subr.mxu1 %v720_v5 }
  0xdd   :  { %693 = vmatpush3.msra.mxu1 %v549_v49  ;;  %694 = vmatprep.mubr.msk.f32.mxu1 %vm727_vm1, %v720_v5 }
 0x192   :  { %v339_v28 = vpop.f32.mrf.mxu1 }
 0x194   :  { %v341_v32 = vpop.f32.mrf.mxu1 }
 0x19a   :  { %v413_v34 = vpop.f32.mrf.mxu1 }
 0x19b   :  { %v414_v35 = vadd.f32 %v413_v34, %v339_v28 }
 0x19c   :  { %v415_v37 = vpop.f32.mrf.mxu1 }
 0x19d   :  { %v430_v38 = vadd.f32 %v423_v33, %v414_v35  ;;  %v416_v39 = vadd.f32 %v415_v37, %v341_v32 }
 0x19f   :  { %v432_v40 = vmul.f32 0.5, %v430_v38  ;;  %v431_v41 = vadd.f32 %v427_v36, %v416_v39 }
 0x1a1   :  { %715 = vtanh.f32 %v432_v40  ;;  %v433_v42 = vmul.f32 0.5, %v431_v41 }
 0x1a3   :  { %717 = vtanh.f32 %v433_v42 }
 0x1ae   :  { %v716_v43 = vpop.eup %715 }
 0x1af   :  { %v436_v44 = vadd.f32 1.0, %v716_v43 }
 0x1b0   :  { %v718_v19 = vpop.eup %717 }
 0x1b1   :  { %v437_v45 = vadd.f32 1.0, %v718_v19  ;;  %v438_v47 = vmul.f32 %v436_v44, %v432_v40 }
 0x1b3   :  { %v439_v46 = vmul.f32 %v437_v45, %v433_v42 }
 0x1b5   :  { %543 = vmatprep.mubr.f32.mxu0 %v439_v46 }
 0x1b6   :  { %544 = vmatmul.mubr.f32.vlgmr.msra.gmra.mxu0 %v438_v47 }
 0x276   :  { %v684_v50 = vpop.f32.mrf.mxu0 }
 0x278   :  { %v685_v52 = vpop.f32.mrf.mxu0 }
 0x279   :  { %v686_v53 = vadd.f32 %v685_v52, %v684_v50 }
 0x27b   :  { %v546_v54 = vadd.f32 %v686_v53, %v649_v51 }
 0x27d   :  { %695 = vmatmul.mubr.msk.f32.vlgmr.msra.gmra.mxu1 %vm558_vm2, %v546_v54 }
 0x33d   :  { %v628_v56 = vpop.f32.mrf.mxu1 }
 0x33e   :  { %v629_v57 = vadd.f32 %v650_v55, %v628_v56 }
 0x33f   :  { %v696_v58 = vpop.f32.mrf.mxu1 }
 0x340   :  { %633 = vst.msk [vmem:[%s987_s9] sm:$0xff] %vm632_vm3, %v629_v57 }

// kernel: score_unet_forward.3
= control target key start
LH: loop header
LB: loop body
LE: loop exit
PB: predicated region body
PF: predicated region fallthrough
CT: control target
= control target key end

     0   :  { %s2421_s24 = smov 0   ;;  %s2423_s25 = smov 0   ;;  %s3218_s0 = inlined_call_operand.vmem [shape: bf16[2,16,2], index: 0, kind: input, shape index: {}]   ;;  %s3219_s1 = inlined_call_operand.vmem [shape: f32[2,256,1], index: 1, kind: input, shape index: {}]   ;;  %s3220_s2 = inlined_call_operand.vmem [shape: bf16[256,16], index: 2, kind: input, shape index: {}]   ;;  %s3221_s3 = inlined_call_operand.vmem [shape: bf16[256,256], index: 3, kind: input, shape index: {}]   ;;  %s3222_s4 = inlined_call_operand.vmem [shape: f32[256,1], index: 4, kind: input, shape index: {}]   ;;  %s3223_s5 = inlined_call_operand.vmem [shape: bf16[16,256], index: 5, kind: input, shape index: {}]   ;;  %s3224_s6 = inlined_call_operand.vmem [shape: f32[16,1], index: 6, kind: input, shape index: {}]   ;;  %s3225_s7 = inlined_call_operand.vmem [shape: f32[2,16,2], index: 7, kind: output, shape index: {}]  }
   0x1   :  { %s2425_s26 = smov 0  }
   0x2 LB: > { %s29_s27 = sadd.s32 1, %s2374_s25  ;;  %p1853_p0 = scmp.ge.s32.totalorder %s2378_s26, 1  ;;  %s2378_s26 = sphi %s2425_s26, %s17_s26   ;;  %s2374_s25 = sphi %s2423_s25, %s3280_s25   ;;  %s2370_s24 = sphi %s2421_s24, %s3279_s24  }
   0x3   : > { %p31_p1 = scmp.ge.s32.totalorder %s29_s27, 2  ;;  %p266_p2 = scmp.lt.s32.totalorder %s2378_s26, 3 }
   0x5   : > { %s3282_s27 = smov (%p31_p1, %s29_s27), 0  ;;  %p267_p3 = pnand %p1853_p0, %p266_p2 }
   0x7   : > { %270 = sbr.rel (%p267_p3) target bundleno = 872 (0x368), region = 48 }
   0xc   : > { %p309_p4 = scmp.lt.s32.totalorder %s2370_s24, 1  ;;  %v2380_v0 = vmov 0   ;;  %v2161_v1 = vld [vmem:[%s3220_s2] sm:$0xff]   ;;  %vm643_vm0 = vcmask 130048   ;;  %v2162_v7 = vld [vmem:[%s3220_s2 + $0x8] sm:$0xff]   ;;  %v2163_v8 = vld [vmem:[%s3220_s2 + $0x10] sm:$0xff]  }
   0xd   : > { %2159 = vset.pattern.permute.xlu1 %v2380_v0  ;;  %2158 = vset.pattern.permute.xlu0 %v2380_v0  ;;  %v2164_v13 = vld [vmem:[%s3220_s2 + $0x18] sm:$0xff]   ;;  %v2165_v14 = vld [vmem:[%s3220_s2 + $0x20] sm:$0xff]   ;;  %v2166_v19 = vld [vmem:[%s3220_s2 + $0x28] sm:$0xff]   ;;  %vm1751_vm1 = vcmask 15360  }
   0xe   : > { %s3284_s24 = smov (!%p309_p4, %s2370_s24), 1  ;;  %2085 = vmatprep.mubr.msk.bf16.mxu0 %vm643_vm0, %v2161_v1  ;;  %v2167_v20 = vld [vmem:[%s3220_s2 + $0x30] sm:$0xff]   ;;  %v2168_v25 = vld [vmem:[%s3220_s2 + $0x38] sm:$0xff]   ;;  %v2169_v26 = vld [vmem:[%s3220_s2 + $0x40] sm:$0xff]  }
   0xf   : > { %s1930_s30 = sshll.u32 %s3284_s24, 8  ;;  %s1929_s8 = sshll.u32 %s3284_s24, 3  ;;  %v2170_v31 = vld [vmem:[%s3220_s2 + $0x48] sm:$0xff]   ;;  %v2171_v32 = vld [vmem:[%s3220_s2 + $0x50] sm:$0xff]   ;;  %v2172_v37 = vld [vmem:[%s3220_s2 + $0x58] sm:$0xff]  }
  0x10   : > { %s2450_s11 = scalar_lea.vmem %s3219_s1, %s1930_s30  ;;  %s316_s14 = scalar_lea.vmem %s3218_s0, %s1929_s8  ;;  %v2173_v38 = vld [vmem:[%s3220_s2 + $0x60] sm:$0xff]   ;;  %v2174_v43 = vld [vmem:[%s3220_s2 + $0x68] sm:$0xff]   ;;  %v2175_v44 = vld [vmem:[%s3220_s2 + $0x70] sm:$0xff]  }
  0x11   : > { %v395_v2 = vld [vmem:[%s2450_s11 + $0xf0] sm:$0xff]  ;;  %v2160_v4 = vld [vmem:[%s316_s14] sm:$0xff]   ;;  %v396_v5 = vld [vmem:[%s2450_s11 + $0xf8] sm:$0xff]  ;;  %s1931_s12 = sshll.u32 %s3284_s24, 4 }
  0x12   : > { %v379_v3 = vld [vmem:[%s2450_s11 + $0x70] sm:$0xff]  ;;  %549 = vperm.xlu0 %2158, %v395_v2   ;;  %v380_v6 = vld [vmem:[%s2450_s11 + $0x78] sm:$0xff]  ;;  %2083 = vmatprep.subr.bf16.mxu0 %v2160_v4  ;;  %v393_v9 = vld [vmem:[%s2450_s11 + $0xe0] sm:$0xff]  ;;  %s329_s14 = scalar_lea.vmem %s3225_s7, %s1931_s12 }
  0x13   : > { %469 = vperm.xlu1 %2159, %v379_v3   ;;  %2084 = vmatpush3.bf16.msra.mxu0 %v2160_v4  ;;  %v394_v10 = vld [vmem:[%s2450_s11 + $0xe8] sm:$0xff]  ;;  %v377_v12 = vld [vmem:[%s2450_s11 + $0x60] sm:$0xff]  ;;  %v392_v15 = vld [vmem:[%s2450_s11 + $0xd8] sm:$0xff] }
  0x14   : > { %v378_v11 = vld [vmem:[%s2450_s11 + $0x68] sm:$0xff]  ;;  %v391_v16 = vld [vmem:[%s2450_s11 + $0xd0] sm:$0xff]  ;;  %v376_v17 = vld [vmem:[%s2450_s11 + $0x58] sm:$0xff] }
  0x15   : > { %v375_v18 = vld [vmem:[%s2450_s11 + $0x50] sm:$0xff]  ;;  %v390_v21 = vld [vmem:[%s2450_s11 + $0xc8] sm:$0xff]  ;;  %v389_v22 = vld [vmem:[%s2450_s11 + $0xc0] sm:$0xff] }
  0x16   : > { %554 = vperm.xlu0 %2158, %v396_v5   ;;  %2086 = vmatmul.mubr.msk.bf16.vlgmr.msra.gmra.mxu0 %vm643_vm0, %v2162_v7  ;;  %v374_v23 = vld [vmem:[%s2450_s11 + $0x48] sm:$0xff]  ;;  %v373_v24 = vld [vmem:[%s2450_s11 + $0x40] sm:$0xff]  ;;  %v388_v27 = vld [vmem:[%s2450_s11 + $0xb8] sm:$0xff] }
  0x17   : > { %474 = vperm.xlu1 %2159, %v380_v6   ;;  %2089 = vmatprep.mubr.msk.bf16.mxu0 %vm643_vm0, %v2163_v8  ;;  %v387_v28 = vld [vmem:[%s2450_s11 + $0xb0] sm:$0xff]  ;;  %v372_v29 = vld [vmem:[%s2450_s11 + $0x38] sm:$0xff]  ;;  %v386_v33 = vld [vmem:[%s2450_s11 + $0xa8] sm:$0xff] }
  0x18   : > { %v371_v30 = vld [vmem:[%s2450_s11 + $0x30] sm:$0xff]  ;;  %v385_v34 = vld [vmem:[%s2450_s11 + $0xa0] sm:$0xff]  ;;  %v370_v35 = vld [vmem:[%s2450_s11 + $0x28] sm:$0xff] }
  0x19   : > { %v369_v36 = vld [vmem:[%s2450_s11 + $0x20] sm:$0xff]  ;;  %v384_v39 = vld [vmem:[%s2450_s11 + $0x98] sm:$0xff]  ;;  %v383_v40 = vld [vmem:[%s2450_s11 + $0x90] sm:$0xff] }
  0x1a   : > { %539 = vperm.xlu0 %2158, %v393_v9   ;;  %v368_v41 = vld [vmem:[%s2450_s11 + $0x18] sm:$0xff]  ;;  %v367_v42 = vld [vmem:[%s2450_s11 + $0x10] sm:$0xff]  ;;  %v382_v45 = vld [vmem:[%s2450_s11 + $0x88] sm:$0xff] }
  0x1b   : > { %544 = vperm.xlu1 %2159, %v394_v10   ;;  %v381_v46 = vld [vmem:[%s2450_s11 + $0x80] sm:$0xff]  ;;  %v366_v47 = vld [vmem:[%s2450_s11 + $0x8] sm:$0xff]  ;;  %v2176_v49 = vld [vmem:[%s3220_s2 + $0x78] sm:$0xff]  }
  0x1c   : > { %v365_v48 = vld [vmem:[%s2450_s11] sm:$0xff]  ;;  %v1060_v50 = vld [vmem:[%s3222_s4 + $0xf8] sm:$0xff]  ;;  %v1059_v51 = vld [vmem:[%s3222_s4 + $0xf0] sm:$0xff] }
  0x1d   : > { %v1044_v52 = vld [vmem:[%s3222_s4 + $0x78] sm:$0xff]  ;;  %v1043_v53 = vld [vmem:[%s3222_s4 + $0x70] sm:$0xff]  ;;  %v1058_v54 = vld [vmem:[%s3222_s4 + $0xe8] sm:$0xff] }
  0x1e   : > { %459 = vperm.xlu0 %2158, %v377_v12   ;;  %2090 = vmatmul.mubr.msk.bf16.gmra.mxu0 %vm643_vm0, %v2164_v13  ;;  %v1057_v55 = vld [vmem:[%s3222_s4 + $0xe0] sm:$0xff]  ;;  %v1042_v56 = vld [vmem:[%s3222_s4 + $0x68] sm:$0xff]  ;;  %v1056_v58 = vld [vmem:[%s3222_s4 + $0xd8] sm:$0xff] }
  0x1f   : > { %464 = vperm.xlu1 %2159, %v378_v11   ;;  %2093 = vmatprep.mubr.msk.bf16.mxu0 %vm643_vm0, %v2165_v14  ;;  %v1041_v57 = vld [vmem:[%s3222_s4 + $0x60] sm:$0xff]  ;;  %v1055_v59 = vld [vmem:[%s3222_s4 + $0xd0] sm:$0xff]  ;;  %v1040_v60 = vld [vmem:[%s3222_s4 + $0x58] sm:$0xff] }
  0x20   : > { %v1039_v61 = vld [vmem:[%s3222_s4 + $0x50] sm:$0xff]  ;;  %v1054_v62 = vld [vmem:[%s3222_s4 + $0xc8] sm:$0xff]  ;;  %v1053_v63 = vld [vmem:[%s3222_s4 + $0xc0] sm:$0xff] }
  0x21   : > { %v1038_v0 = vld [vmem:[%s3222_s4 + $0x48] sm:$0xff]  ;;  %v1037_v1 = vld [vmem:[%s3222_s4 + $0x40] sm:$0xff]  ;;  %v1052_v2 = vld [vmem:[%s3222_s4 + $0xb8] sm:$0xff] }
  0x22   : > { %529 = vperm.xlu0 %2158, %v391_v16   ;;  %v1051_v3 = vld [vmem:[%s3222_s4 + $0xb0] sm:$0xff]  ;;  %v1036_v4 = vld [vmem:[%s3222_s4 + $0x38] sm:$0xff]  ;;  %v1050_v6 = vld [vmem:[%s3222_s4 + $0xa8] sm:$0xff] }
  0x23   : > { %534 = vperm.xlu1 %2159, %v392_v15   ;;  %v1035_v5 = vld [vmem:[%s3222_s4 + $0x30] sm:$0xff]  ;;  %v1049_v7 = vld [vmem:[%s3222_s4 + $0xa0] sm:$0xff]  ;;  %v1034_v8 = vld [vmem:[%s3222_s4 + $0x28] sm:$0xff] }
  0x24   : > { %v1033_v9 = vld [vmem:[%s3222_s4 + $0x20] sm:$0xff]  ;;  %v1048_v10 = vld [vmem:[%s3222_s4 + $0x98] sm:$0xff]  ;;  %v1047_v11 = vld [vmem:[%s3222_s4 + $0x90] sm:$0xff] }
  0x25   : > { %v1032_v12 = vld [vmem:[%s3222_s4 + $0x18] sm:$0xff]  ;;  %v1031_v13 = vld [vmem:[%s3222_s4 + $0x10] sm:$0xff]  ;;  %v1046_v14 = vld [vmem:[%s3222_s4 + $0x88] sm:$0xff] }
  0x26   : > { %449 = vperm.xlu0 %2158, %v375_v18   ;;  %2094 = vmatmul.mubr.msk.bf16.gmra.mxu0 %vm643_vm0, %v2166_v19  ;;  %v1045_v15 = vld [vmem:[%s3222_s4 + $0x80] sm:$0xff]  ;;  %v1030_v16 = vld [vmem:[%s3222_s4 + $0x8] sm:$0xff] }
  0x27   : > { %454 = vperm.xlu1 %2159, %v376_v17   ;;  %2097 = vmatprep.mubr.msk.bf16.mxu0 %vm643_vm0, %v2167_v20  ;;  %v1029_v17 = vld [vmem:[%s3222_s4] sm:$0xff]  ;;  %v1689_v20 = vld [vmem:[%s3224_s6 + $0x8] sm:$0xff] }
  0x2a   : > { %519 = vperm.xlu0 %2158, %v389_v22  }
  0x2b   : > { %524 = vperm.xlu1 %2159, %v390_v21   ;;  %v1688_v21 = vld [vmem:[%s3224_s6] sm:$0xff] }
  0x2e   : > { %439 = vperm.xlu0 %2158, %v373_v24   ;;  %2098 = vmatmul.mubr.msk.bf16.gmra.mxu0 %vm643_vm0, %v2168_v25 }
  0x2f   : > { %444 = vperm.xlu1 %2159, %v374_v23   ;;  %2101 = vmatprep.mubr.msk.bf16.mxu0 %vm643_vm0, %v2169_v26 }
  0x32   : > { %509 = vperm.xlu0 %2158, %v387_v28  }
  0x33   : > { %514 = vperm.xlu1 %2159, %v388_v27  }
  0x36   : > { %429 = vperm.xlu0 %2158, %v371_v30   ;;  %2102 = vmatmul.mubr.msk.bf16.gmra.mxu0 %vm643_vm0, %v2170_v31 }
  0x37   : > { %434 = vperm.xlu1 %2159, %v372_v29   ;;  %2105 = vmatprep.mubr.msk.bf16.mxu0 %vm643_vm0, %v2171_v32 }
  0x3a   : > { %499 = vperm.xlu0 %2158, %v385_v34  }
  0x3b   : > { %504 = vperm.xlu1 %2159, %v386_v33  }
  0x3e   : > { %419 = vperm.xlu0 %2158, %v369_v36   ;;  %2106 = vmatmul.mubr.msk.bf16.gmra.mxu0 %vm643_vm0, %v2172_v37 }
  0x3f   : > { %424 = vperm.xlu1 %2159, %v370_v35   ;;  %2109 = vmatprep.mubr.msk.bf16.mxu0 %vm643_vm0, %v2173_v38 }
  0x42   : > { %489 = vperm.xlu0 %2158, %v383_v40  }
  0x43   : > { %494 = vperm.xlu1 %2159, %v384_v39  }
  0x46   : > { %409 = vperm.xlu0 %2158, %v367_v42   ;;  %2110 = vmatmul.mubr.msk.bf16.gmra.mxu0 %vm643_vm0, %v2174_v43 }
  0x47   : > { %414 = vperm.xlu1 %2159, %v368_v41   ;;  %2113 = vmatprep.mubr.msk.bf16.mxu0 %vm643_vm0, %v2175_v44 }
  0x4a   : > { %479 = vperm.xlu0 %2158, %v381_v46   ;;  %v2182_v46 = vld [vmem:[%s3221_s3 + $0x54] ss:$8 sps:$4 sm:$0xff]  }
  0x4b   : > { %484 = vperm.xlu1 %2159, %v382_v45   ;;  %v2179_v45 = vld [vmem:[%s3221_s3 + $0x4] ss:$8 sps:$4 sm:$0xff]   ;;  %1453 = vmatprep.mubr.bf16.mxu1 %v2182_v46 }
  0x4e   : > { %399 = vperm.xlu0 %2158, %v365_v48   ;;  %2114 = vmatmul.mubr.msk.bf16.gmra.mxu0 %vm643_vm0, %v2176_v49 }
  0x4f   : > { %404 = vperm.xlu1 %2159, %v366_v47   ;;  %1413 = vmatprep.mubr.bf16.mxu0 %v2179_v45 }
  0x52   : > { %1213 = vperm.xlu0 %2158, %v1059_v51  }
  0x53   : > { %1218 = vperm.xlu1 %2159, %v1060_v50  }
  0x56   : > { %1133 = vperm.xlu0 %2158, %v1043_v53  }
  0x57   : > { %1138 = vperm.xlu1 %2159, %v1044_v52  }
  0x5a   : > { %1203 = vperm.xlu0 %2158, %v1057_v55  }
  0x5b   : > { %1208 = vperm.xlu1 %2159, %v1058_v54  }
  0x5e   : > { %1123 = vperm.xlu0 %2158, %v1041_v57  }
  0x5f   : > { %1128 = vperm.xlu1 %2159, %v1042_v56  }
  0x62   : > { %1193 = vperm.xlu0 %2158, %v1055_v59  }
  0x63   : > { %1198 = vperm.xlu1 %2159, %v1056_v58  }
  0x66   : > { %1113 = vperm.xlu0 %2158, %v1039_v61  }
  0x67   : > { %1118 = vperm.xlu1 %2159, %v1040_v60  }
  0x6a   : > { %1183 = vperm.xlu0 %2158, %v1053_v63  }
  0x6b   : > { %1188 = vperm.xlu1 %2159, %v1054_v62  }
  0x6e   : > { %1103 = vperm.xlu0 %2158, %v1037_v1  }
  0x6f   : > { %1108 = vperm.xlu1 %2159, %v1038_v0  }
  0x72   : > { %1173 = vperm.xlu0 %2158, %v1051_v3  }
  0x73   : > { %1178 = vperm.xlu1 %2159, %v1052_v2  }
  0x76   : > { %1093 = vperm.xlu0 %2158, %v1035_v5  }
  0x77   : > { %1098 = vperm.xlu1 %2159, %v1036_v4  }
  0x7a   : > { %1163 = vperm.xlu0 %2158, %v1049_v7  }
  0x7b   : > { %1168 = vperm.xlu1 %2159, %v1050_v6  }
  0x7e   : > { %1083 = vperm.xlu0 %2158, %v1033_v9  }
  0x7f   : > { %1088 = vperm.xlu1 %2159, %v1034_v8  }
  0x82   : > { %1153 = vperm.xlu0 %2158, %v1047_v11  }
  0x83   : > { %1158 = vperm.xlu1 %2159, %v1048_v10  }
  0x86   : > { %1073 = vperm.xlu0 %2158, %v1031_v13  }
  0x87   : > { %1078 = vperm.xlu1 %2159, %v1032_v12  }
  0x8a   : > { %1143 = vperm.xlu0 %2158, %v1045_v15  }
  0x8b   : > { %1148 = vperm.xlu1 %2159, %v1046_v14  }
  0x8d   : > { %v2643_v18 = vpop.permute.xlu0 %549 }
  0x8e   : > { %v2645_v19 = vpop.permute.xlu1 %469  ;;  %1063 = vperm.xlu0 %2158, %v1029_v17  }
  0x8f   : > { %1068 = vperm.xlu1 %2159, %v1030_v16  }
  0x91   : > { %v2653_v22 = vpop.permute.xlu0 %554 }
  0x92   : > { %v2655_v23 = vpop.permute.xlu1 %474  ;;  %1692 = vperm.xlu0 %2158, %v1688_v21  }
  0x93   : > { %1697 = vperm.xlu1 %2159, %v1689_v20  }
  0x95   : > { %v2657_v24 = vpop.permute.xlu0 %539 }
  0x96   : > { %v2659_v25 = vpop.permute.xlu1 %544 }
  0x99   : > { %v2663_v27 = vpop.permute.xlu0 %459 }
  0x9a   : > { %v2661_v26 = vpop.permute.xlu1 %464 }
  0x9d   : > { %v2667_v29 = vpop.permute.xlu0 %529 }
  0x9e   : > { %v2665_v28 = vpop.permute.xlu1 %534 }
  0xa1   : > { %v2669_v30 = vpop.permute.xlu0 %449 }
  0xa2   : > { %v2671_v31 = vpop.permute.xlu1 %454 }
  0xa5   : > { %v2673_v32 = vpop.permute.xlu0 %519 }
  0xa6   : > { %v2675_v33 = vpop.permute.xlu1 %524 }
  0xa9   : > { %v2677_v34 = vpop.permute.xlu0 %439 }
  0xaa   : > { %v2679_v35 = vpop.permute.xlu1 %444 }
  0xad   : > { %v2681_v36 = vpop.permute.xlu0 %509 }
  0xae   : > { %v2683_v37 = vpop.permute.xlu1 %514 }
  0xb1   : > { %v430_v38 = vpop.permute.xlu0 %429 }
  0xb2   : > { %v435_v39 = vpop.permute.xlu1 %434 }
  0xb5   : > { %v2685_v40 = vpop.permute.xlu0 %499 }
  0xb6   : > { %v2687_v41 = vpop.permute.xlu1 %504 }
  0xb9   : > { %v420_v42 = vpop.permute.xlu0 %419 }
  0xba   : > { %v425_v43 = vpop.permute.xlu1 %424 }
  0xbd   : > { %v2689_v44 = vpop.permute.xlu0 %489 }
  0xbe   : > { %v2697_v47 = vpop.permute.xlu1 %494 }
  0xc1   : > { %v410_v48 = vpop.permute.xlu0 %409 }
  0xc2   : > { %v415_v49 = vpop.permute.xlu1 %414 }
  0xc5   : > { %v2699_v50 = vpop.permute.xlu0 %479 }
  0xc6   : > { %v2701_v51 = vpop.permute.xlu1 %484 }
  0xc9   : > { %v400_v54 = vpop.permute.xlu0 %399 }
  0xca   : > { %v405_v61 = vpop.permute.xlu1 %404 }
  0xd6   : > { %v2087_v52 = vpop.f32.mrf.mxu0 }
  0xd7   : > { %v735_v53 = vadd.f32 %v2087_v52, %v410_v48 }
  0xd8   : > { %v726_v55 = vpop.f32.mrf.mxu0 }
  0xd9   : > { %v855_v56 = vmul.f32 0.5, %v735_v53  ;;  %v727_v57 = vadd.f32 %v726_v55, %v400_v54 }
  0xda   : > { %v2088_v58 = vpop.f32.mrf.mxu0 }
  0xdb   : > { %2228 = vtanh.f32 %v855_v56  ;;  %v853_v59 = vmul.f32 0.5, %v727_v57  ;;  %v738_v60 = vadd.f32 %v2088_v58, %v415_v49 }
  0xdc   : > { %v729_v62 = vpop.f32.mrf.mxu0 }
  0xdd   : > { %2230 = vtanh.f32 %v853_v59  ;;  %v856_v63 = vmul.f32 0.5, %v738_v60  ;;  %v730_v0 = vadd.f32 %v729_v62, %v405_v61 }
  0xde   : > { %v2091_v1 = vpop.f32.mrf.mxu0 }
  0xdf   : > { %2232 = vtanh.f32 %v856_v63  ;;  %v854_v2 = vmul.f32 0.5, %v730_v0  ;;  %v751_v3 = vadd.f32 %v2091_v1, %v430_v38 }
  0xe0   : > { %v742_v4 = vpop.f32.mrf.mxu0 }
  0xe1   : > { %2234 = vtanh.f32 %v854_v2  ;;  %v859_v5 = vmul.f32 0.5, %v751_v3  ;;  %v743_v6 = vadd.f32 %v742_v4, %v420_v42 }
  0xe2   : > { %v2092_v7 = vpop.f32.mrf.mxu0 }
  0xe3   : > { %2236 = vtanh.f32 %v859_v5  ;;  %v857_v8 = vmul.f32 0.5, %v743_v6  ;;  %v754_v9 = vadd.f32 %v2092_v7, %v435_v39 }
  0xe4   : > { %v745_v10 = vpop.f32.mrf.mxu0 }
  0xe5   : > { %2238 = vtanh.f32 %v857_v8  ;;  %v860_v11 = vmul.f32 0.5, %v754_v9  ;;  %v746_v12 = vadd.f32 %v745_v10, %v425_v43 }
  0xe6   : > { %v2703_v13 = vpop.f32.mrf.mxu0 }
  0xe7   : > { %2240 = vtanh.f32 %v860_v11  ;;  %v858_v14 = vmul.f32 0.5, %v746_v12 }
  0xe8   : > { %v2229_v15 = vpop.eup %2228  ;;  %v2705_v16 = vpop.f32.mrf.mxu0 }
  0xe9   : > { %2242 = vtanh.f32 %v858_v14  ;;  %v919_v21 = vadd.f32 1.0, %v2229_v15 }
  0xea   : > { %v2231_v17 = vpop.eup %2230  ;;  %v2096_v20 = vpop.f32.mrf.mxu0 }
  0xeb   : > { %v917_v45 = vadd.f32 1.0, %v2231_v17  ;;  %v951_v49 = vmul.f32 %v919_v21, %v855_v56 }
  0xec   : > { %v2233_v38 = vpop.eup %2232  ;;  %v2707_v42 = vpop.f32.mrf.mxu0 }
  0xed   : > { %v920_v39 = vadd.f32 1.0, %v2233_v38  ;;  %v949_v55 = vmul.f32 %v917_v45, %v853_v59 }
  0xee   : > { %v2235_v46 = vpop.eup %2234  ;;  %v2099_v48 = vpop.f32.mrf.mxu0 }
  0xef   : > { %v952_v43 = vmul.f32 %v920_v39, %v856_v63  ;;  %v918_v52 = vadd.f32 1.0, %v2235_v46 }
  0xf0   : > { %v2237_v53 = vpop.eup %2236  ;;  %v774_v54 = vpop.f32.mrf.mxu0 }
  0xf1   : > { %v2709_v57 = vpack.c.bf16 %v952_v43, %v951_v49  ;;  %v950_v58 = vmul.f32 %v918_v52, %v854_v2  ;;  %v923_v0 = vadd.f32 1.0, %v2237_v53  ;;  %v783_v52 = vadd.f32 %v2099_v48, %v2645_v19 }
  0xf2   : > { %v2239_v60 = vpop.eup %2238  ;;  %v2100_v61 = vpop.f32.mrf.mxu0  ;;  %v775_v19 = vadd.f32 %v774_v54, %v2663_v27 }
  0xf3   : > { %v2711_v62 = vpack.c.bf16 %v950_v58, %v949_v55  ;;  %v921_v4 = vadd.f32 1.0, %v2239_v60  ;;  %v955_v56 = vmul.f32 %v923_v0, %v859_v5  ;;  %v770_v5 = vadd.f32 %v2096_v20, %v2671_v31 }
  0xf4   : > { %v2241_v1 = vpop.eup %2240  ;;  %v777_v3 = vpop.f32.mrf.mxu0  ;;  %v2731_v60 = vmul.f32 0.5, %v783_v52 }
  0xf5   : > { %v924_v6 = vadd.f32 1.0, %v2241_v1  ;;  %v953_v59 = vmul.f32 %v921_v4, %v857_v8  ;;  %v786_v8 = vadd.f32 %v2100_v61, %v2655_v23  ;;  %v2729_v55 = vmul.f32 0.5, %v770_v5 }
  0xf6   : > { %v2243_v7 = vpop.eup %2242  ;;  %v2713_v9 = vpop.f32.mrf.mxu0 }
  0xf7   : > { %v956_v63 = vmul.f32 %v924_v6, %v860_v11  ;;  %v922_v10 = vadd.f32 1.0, %v2243_v7  ;;  %v2734_v1 = vmul.f32 0.5, %v786_v8  ;;  %2244 = vtanh.f32 %v2729_v55 }
  0xf8   : > { %v2715_v12 = vpop.f32.mrf.mxu0  ;;  %2246 = vtanh.f32 %v2731_v60 }
  0xf9   : > { %v2717_v15 = vpack.c.bf16 %v956_v63, %v955_v56  ;;  %v954_v2 = vmul.f32 %v922_v10, %v858_v14  ;;  %v778_v14 = vadd.f32 %v777_v3, %v2661_v26  ;;  %2248 = vtanh.f32 %v2734_v1 }
  0xfa   : > { %v2719_v17 = vpop.f32.mrf.mxu0  ;;  %v2756_v3 = vmul.f32 0.5, %v775_v19 }
  0xfb   : > { %v2721_v21 = vpack.c.bf16 %v954_v2, %v953_v59  ;;  %v2736_v6 = vmul.f32 0.5, %v778_v14 }
  0xfc   : > { %v2723_v38 = vpop.f32.mrf.mxu0 }
  0xfd   : > { %2250 = vtanh.f32 %v2736_v6 }
  0xfe   : > { %v2107_v45 = vpop.f32.mrf.mxu0 }
 0x100   : > { %v806_v39 = vpop.f32.mrf.mxu0 }
 0x102   : > { %v2108_v46 = vpop.f32.mrf.mxu0 }
 0x104   : > { %v809_v49 = vpop.f32.mrf.mxu0 }
 0x105   : > { %v810_v2 = vadd.f32 %v809_v49, %v2687_v41 }
 0x106   : > { %v2111_v43 = vpop.f32.mrf.mxu0 }
 0x107   : > { %v831_v26 = vadd.f32 %v2111_v43, %v2667_v29  ;;  %v767_v29 = vadd.f32 %v2703_v13, %v2669_v30  ;;  %v818_v30 = vadd.f32 %v2108_v46, %v2683_v37  ;;  %v802_v43 = vadd.f32 %v2719_v17, %v2697_v47 }
 0x108   : > { %v822_v11 = vpop.f32.mrf.mxu0  ;;  %v2799_v49 = vmul.f32 0.5, %v810_v2  ;;  %v794_v17 = vadd.f32 %v2723_v38, %v2701_v51 }
 0x109   : > { %v2759_v7 = vmul.f32 0.5, %v831_v26  ;;  %v823_v56 = vadd.f32 %v822_v11, %v2673_v32  ;;  %v2770_v10 = vmul.f32 0.5, %v767_v29  ;;  %v759_v32 = vadd.f32 %v2705_v16, %v2677_v34  ;;  %v2245_v16 = vpop.eup %2244 }
 0x10a   : > { %v2112_v53 = vpop.f32.mrf.mxu0  ;;  %v2784_v37 = vmul.f32 0.5, %v818_v30  ;;  %v2247_v46 = vpop.eup %2246  ;;  %v799_v11 = vadd.f32 %v2713_v9, %v2689_v44  ;;  %v791_v9 = vadd.f32 %v2715_v12, %v2699_v50 }
 0x10b   : > { %v834_v0 = vadd.f32 %v2112_v53, %v2665_v28  ;;  %v2789_v34 = vmul.f32 0.5, %v759_v32  ;;  %v2249_v41 = vpop.eup %2248  ;;  %v2807_v53 = vmul.f32 0.5, %v802_v43 }
 0x10c   : > { %v825_v58 = vpop.f32.mrf.mxu0  ;;  %v2251_v5 = vpop.eup %2250  ;;  %v932_v8 = vadd.f32 1.0, %v2249_v41 }
 0x10d   : > { %v2743_v20 = vmul.f32 0.5, %v834_v0  ;;  %v826_v27 = vadd.f32 %v825_v58, %v2675_v33  ;;  %v762_v33 = vadd.f32 %v2707_v42, %v2679_v35  ;;  %v815_v35 = vadd.f32 %v2107_v45, %v2681_v36 }
 0x10e   : > { %v2115_v4 = vpop.f32.mrf.mxu0  ;;  %v2779_v42 = vmul.f32 0.5, %v823_v56  ;;  %v807_v45 = vadd.f32 %v806_v39, %v2685_v40  ;;  %v931_v0 = vadd.f32 1.0, %v2247_v46  ;;  %v930_v26 = vadd.f32 1.0, %v2251_v5 }
 0x10f   : > { %v847_v23 = vadd.f32 %v2115_v4, %v2643_v18  ;;  %v2768_v13 = vmul.f32 0.5, %v826_v27  ;;  %v2791_v36 = vmul.f32 0.5, %v815_v35  ;;  %v2812_v4 = vmul.f32 0.5, %v799_v11 }
 0x110   : > { %v838_v31 = vpop.f32.mrf.mxu0  ;;  %v2805_v39 = vmul.f32 0.5, %v807_v45  ;;  %v963_v50 = vmul.f32 %v931_v0, %v2731_v60  ;;  %v962_v2 = vmul.f32 %v930_v26, %v2736_v6 }
 0x111   : > { %v839_v28 = vadd.f32 %v838_v31, %v2657_v24  ;;  %v2747_v48 = vmul.f32 0.5, %v847_v23  ;;  %v964_v31 = vmul.f32 %v932_v8, %v2734_v1  ;;  %v928_v1 = vadd.f32 1.0, %v2245_v16 }
 0x112   : > { %v2116_v61 = vpop.f32.mrf.mxu0 }
 0x113   : > { %v2751_v54 = vmul.f32 0.5, %v839_v28  ;;  %v850_v18 = vadd.f32 %v2116_v61, %v2653_v22  ;;  %2252 = vtanh.f32 %v2747_v48  ;;  %v2819_v28 = vmul.f32 0.5, %v794_v17 }
 0x114   : > { %v841_v24 = vpop.f32.mrf.mxu0  ;;  %2254 = vtanh.f32 %v2743_v20  ;;  %v988_v35 = vpack.c.bf16 %v964_v31, %v963_v50 }
 0x115   : > { %v884_v63 = vmul.f32 0.5, %v850_v18  ;;  %2256 = vtanh.f32 %v2751_v54  ;;  %v842_v22 = vadd.f32 %v841_v24, %v2659_v25  ;;  %v2781_v25 = vmul.f32 0.5, %v762_v33 }
 0x116   : > { %v2824_v33 = vmul.f32 0.5, %v791_v9 }
 0x117   : > { %2258 = vtanh.f32 %v884_v63  ;;  %v2775_v59 = vmul.f32 0.5, %v842_v22 }
 0x118   : > { %2260 = vtanh.f32 %v2756_v3 }
 0x119   : > { %2262 = vtanh.f32 %v2759_v7 }
 0x11a   : > { %2264 = vtanh.f32 %v2775_v59 }
 0x11b   : > { %2266 = vtanh.f32 %v2768_v13 }
 0x11c   : > { %2268 = vtanh.f32 %v2770_v10 }
 0x11d   : > { %2270 = vtanh.f32 %v2779_v42 }
 0x11e   : > { %2272 = vtanh.f32 %v2781_v25 }
 0x11f   : > { %2274 = vtanh.f32 %v2784_v37 }
 0x120   : > { %2276 = vtanh.f32 %v2789_v34  ;;  %v2253_v40 = vpop.eup %2252 }
 0x121   : > { %2278 = vtanh.f32 %v2791_v36  ;;  %v2255_v52 = vpop.eup %2254  ;;  %v947_v14 = vadd.f32 1.0, %v2253_v40  ;;  %v960_v40 = vmul.f32 %v928_v1, %v2729_v55 }
 0x122   : > { %v2257_v47 = vpop.eup %2256  ;;  %2280 = vtanh.f32 %v2799_v49  ;;  %v944_v61 = vadd.f32 1.0, %v2255_v52 }
 0x123   : > { %2282 = vtanh.f32 %v2805_v39  ;;  %v945_v51 = vadd.f32 1.0, %v2257_v47  ;;  %v979_v27 = vmul.f32 %v947_v14, %v2747_v48 }
 0x124   : > { %v2259_v58 = vpop.eup %2258  ;;  %2284 = vtanh.f32 %v2807_v53  ;;  %v976_v60 = vmul.f32 %v944_v61, %v2743_v20 }
 0x125   : > { %v2261_v44 = vpop.eup %2260  ;;  %v948_v19 = vadd.f32 1.0, %v2259_v58  ;;  %2286 = vtanh.f32 %v2812_v4  ;;  %v977_v48 = vmul.f32 %v945_v51, %v2751_v54 }
 0x126   : > { %v2263_v23 = vpop.eup %2262  ;;  %v929_v12 = vadd.f32 1.0, %v2261_v44  ;;  %2288 = vtanh.f32 %v2819_v28 }
 0x127   : > { %v2265_v38 = vpop.eup %2264  ;;  %v980_v18 = vmul.f32 %v948_v19, %v884_v63  ;;  %v943_v22 = vadd.f32 1.0, %v2263_v23  ;;  %2290 = vtanh.f32 %v2824_v33 }
 0x128   : > { %v2267_v29 = vpop.eup %2266  ;;  %v946_v24 = vadd.f32 1.0, %v2265_v38  ;;  %v961_v41 = vmul.f32 %v929_v12, %v2756_v3 }
 0x129   : > { %v2269_v56 = vpop.eup %2268  ;;  %v996_v30 = vpack.c.bf16 %v980_v18, %v979_v27  ;;  %v942_v46 = vadd.f32 1.0, %v2267_v29  ;;  %v975_v54 = vmul.f32 %v943_v22, %v2759_v7  ;;  %v2191_v22 = vld [vmem:[%s3221_s3 + $0x74] ss:$8 sps:$4 sm:$0xff]  }
 0x12a   : > { %v2271_v32 = vpop.eup %2270  ;;  %v978_v63 = vmul.f32 %v946_v24, %v2775_v59  ;;  %v927_v43 = vadd.f32 1.0, %v2269_v56  ;;  %v987_v52 = vpack.c.bf16 %v962_v2, %v961_v41  ;;  %v2197_v2 = vld [vmem:[%s3221_s3 + $0x84] ss:$8 sps:$4 sm:$0xff]   ;;  %v2209_v41 = vld [vmem:[%s3221_s3 + $0xa0] ss:$8 sps:$4 sm:$0xff]  }
 0x12b   : > { %v2273_v45 = vpop.eup %2272  ;;  %1949 = vmatprep.subr.bf16.mxu0 %v996_v30  ;;  %2117 = vmatprep.subr.bf16.mxu1 %v996_v30  ;;  %v941_v59 = vadd.f32 1.0, %v2271_v32  ;;  %v974_v47 = vmul.f32 %v942_v46, %v2768_v13  ;;  %v994_v3 = vpack.c.bf16 %v976_v60, %v975_v54  ;;  %v2193_v30 = vld [vmem:[%s3221_s3 + $0x20] ss:$8 sps:$4 sm:$0xff]   ;;  %v2194_v32 = vld [vmem:[%s3221_s3 + $0x70] ss:$8 sps:$4 sm:$0xff]  }
 0x12c   : > { %v2275_v16 = vpop.eup %2274  ;;  %1950 = vmatpush3.bf16.msra.mxu0 %v988_v35  ;;  %2125 = vmatpush3.bf16.msra.mxu1 %v988_v35  ;;  %v995_v5 = vpack.c.bf16 %v978_v63, %v977_v48  ;;  %v926_v20 = vadd.f32 1.0, %v2273_v45  ;;  %v959_v14 = vmul.f32 %v927_v43, %v2770_v10  ;;  %v2195_v35 = vld [vmem:[%s3221_s3 + $0x34] ss:$8 sps:$4 sm:$0xff]   ;;  %v2199_v48 = vld [vmem:[%s3221_s3 + $0x30] ss:$8 sps:$4 sm:$0xff]  }
 0x12d   : > { %v2277_v6 = vpop.eup %2276  ;;  %v940_v8 = vadd.f32 1.0, %v2275_v16  ;;  %v973_v7 = vmul.f32 %v941_v59, %v2779_v42  ;;  %v2200_v63 = vld [vmem:[%s3221_s3 + $0x80] ss:$8 sps:$4 sm:$0xff]   ;;  %v2201_v45 = vld [vmem:[%s3221_s3 + $0x44] ss:$8 sps:$4 sm:$0xff]  }
 0x12e   : > { %v2279_v11 = vpop.eup %2278  ;;  %1951 = vmatprep.subr.bf16.mxu0 %v995_v5  ;;  %2118 = vmatprep.subr.bf16.mxu1 %v995_v5  ;;  %v925_v58 = vadd.f32 1.0, %v2277_v6  ;;  %v986_v44 = vpack.c.bf16 %v960_v40, %v959_v14  ;;  %v958_v9 = vmul.f32 %v926_v20, %v2781_v25  ;;  %v2203_v60 = vld [vmem:[%s3221_s3 + $0x94] ss:$8 sps:$4 sm:$0xff]   ;;  %v2205_v46 = vld [vmem:[%s3221_s3 + $0x40] ss:$8 sps:$4 sm:$0xff]  }
 0x12f   : > { %v2281_v17 = vpop.eup %2280  ;;  %v939_v0 = vadd.f32 1.0, %v2279_v11  ;;  %v972_v23 = vmul.f32 %v940_v8, %v2784_v37  ;;  %v993_v31 = vpack.c.bf16 %v974_v47, %v973_v7  ;;  %v2206_v16 = vld [vmem:[%s3221_s3 + $0x90] ss:$8 sps:$4 sm:$0xff]   ;;  %v2207_v43 = vld [vmem:[%s3221_s3 + $0xa4] ss:$8 sps:$4 sm:$0xff]  }
 0x130   : > { %1952 = vmatpush3.bf16.msra.mxu0 %v987_v52  ;;  %2126 = vmatpush3.bf16.msra.mxu1 %v987_v52  ;;  %v2283_v55 = vpop.eup %2282  ;;  %v938_v13 = vadd.f32 1.0, %v2281_v17  ;;  %v957_v26 = vmul.f32 %v925_v58, %v2789_v34  ;;  %v2210_v5 = vld [vmem:[%s3221_s3 + $0xb4] ss:$8 sps:$4 sm:$0xff]   ;;  %v2212_v6 = vld [vmem:[%s3221_s3 + $0xb0] ss:$8 sps:$4 sm:$0xff]   ;;  %v2948_v17 = vpop.permute.xlu1 %1218 }
 0x131   : > { %1953 = vmatprep.subr.bf16.mxu0 %v994_v3  ;;  %2119 = vmatprep.subr.bf16.mxu1 %v994_v3  ;;  %v2285_v19 = vpop.eup %2284  ;;  %v971_v51 = vmul.f32 %v939_v0, %v2791_v36  ;;  %v937_v38 = vadd.f32 1.0, %v2283_v55  ;;  %v2213_v54 = vld [vmem:[%s3221_s3 + $0xc4] ss:$8 sps:$4 sm:$0xff]   ;;  %v2215_v59 = vld [vmem:[%s3221_s3 + $0xc0] ss:$8 sps:$4 sm:$0xff]   ;;  %v2946_v3 = vpop.permute.xlu0 %1213 }
 0x132   : > { %v2287_v10 = vpop.eup %2286  ;;  %v985_v42 = vpack.c.bf16 %v958_v9, %v957_v26  ;;  %v936_v61 = vadd.f32 1.0, %v2285_v19  ;;  %v970_v27 = vmul.f32 %v938_v13, %v2799_v49  ;;  %v2216_v11 = vld [vmem:[%s3221_s3 + $0xd4] ss:$8 sps:$4 sm:$0xff]   ;;  %v2218_v40 = vld [vmem:[%s3221_s3 + $0xd0] ss:$8 sps:$4 sm:$0xff]  }
 0x133   : > { %v992_v25 = vpack.c.bf16 %v972_v23, %v971_v51  ;;  %v2289_v18 = vpop.eup %2288  ;;  %v935_v37 = vadd.f32 1.0, %v2287_v10  ;;  %v969_v29 = vmul.f32 %v937_v38, %v2805_v39  ;;  %v2219_v20 = vld [vmem:[%s3221_s3 + $0xe4] ss:$8 sps:$4 sm:$0xff]   ;;  %v2221_v52 = vld [vmem:[%s3221_s3 + $0xe0] ss:$8 sps:$4 sm:$0xff]  }
 0x134   : > { %1954 = vmatpush3.bf16.msra.mxu0 %v986_v44  ;;  %2127 = vmatpush3.bf16.msra.mxu1 %v986_v44  ;;  %v2291_v34 = vpop.eup %2290  ;;  %v968_v50 = vmul.f32 %v936_v61, %v2807_v53  ;;  %v934_v36 = vadd.f32 1.0, %v2289_v18  ;;  %v2222_v8 = vld [vmem:[%s3221_s3 + $0xf4] ss:$8 sps:$4 sm:$0xff]   ;;  %v2224_v47 = vld [vmem:[%s3221_s3 + $0xf0] ss:$8 sps:$4 sm:$0xff]   ;;  %v2950_v58 = vpop.permute.xlu1 %1138 }
 0x135   : > { %1955 = vmatprep.subr.bf16.mxu0 %v993_v31  ;;  %2120 = vmatprep.subr.bf16.mxu1 %v993_v31  ;;  %v991_v12 = vpack.c.bf16 %v970_v27, %v969_v29  ;;  %v967_v49 = vmul.f32 %v935_v37, %v2812_v4  ;;  %v933_v24 = vadd.f32 1.0, %v2291_v34  ;;  %v2180_v4 = vld [vmem:[%s3221_s3 + $0x50] ss:$8 sps:$4 sm:$0xff]   ;;  %v1134_v14 = vpop.permute.xlu0 %1133 }
 0x136   : > { %v966_v56 = vmul.f32 %v934_v36, %v2819_v28  ;;  %v2187_v28 = vld [vmem:[%s3221_s3 + $0x10] ss:$8 sps:$4 sm:$0xff]  }
 0x137   : > { %v990_v1 = vpack.c.bf16 %v968_v50, %v967_v49  ;;  %v965_v39 = vmul.f32 %v933_v24, %v2824_v33  ;;  %v2189_v33 = vld [vmem:[%s3221_s3 + $0x24] ss:$8 sps:$4 sm:$0xff]  }
 0x138   : > { %1956 = vmatpush3.bf16.msra.mxu0 %v985_v42  ;;  %2128 = vmatpush3.bf16.msra.mxu1 %v985_v42  ;;  %v2954_v7 = vpop.permute.xlu1 %1208 }
 0x139   : > { %1957 = vmatprep.subr.bf16.mxu0 %v992_v25  ;;  %2121 = vmatprep.subr.bf16.mxu1 %v992_v25  ;;  %v989_v53 = vpack.c.bf16 %v966_v56, %v965_v39  ;;  %v2952_v0 = vpop.permute.xlu0 %1203 }
 0x13c   : > { %1958 = vmatpush3.bf16.msra.mxu0 %v2717_v15  ;;  %2129 = vmatpush3.bf16.msra.mxu1 %v2717_v15  ;;  %v2177_v15 = vld [vmem:[%s3221_s3] ss:$8 sps:$4 sm:$0xff]   ;;  %v1129_v44 = vpop.permute.xlu1 %1128 }
 0x13d   : > { %1959 = vmatprep.subr.bf16.mxu0 %v991_v12  ;;  %2122 = vmatprep.subr.bf16.mxu1 %v991_v12  ;;  %v1124_v55 = vpop.permute.xlu0 %1123 }
 0x140   : > { %1960 = vmatpush3.bf16.msra.mxu0 %v2721_v21  ;;  %2130 = vmatpush3.bf16.msra.mxu1 %v2721_v21  ;;  %v2183_v21 = vld [vmem:[%s3221_s3 + $0x14] ss:$8 sps:$4 sm:$0xff]   ;;  %v2958_v19 = vpop.permute.xlu1 %1198 }
 0x141   : > { %1961 = vmatprep.subr.bf16.mxu0 %v990_v1  ;;  %2123 = vmatprep.subr.bf16.mxu1 %v990_v1  ;;  %v2956_v9 = vpop.permute.xlu0 %1193 }
 0x144   : > { %1962 = vmatpush3.bf16.msra.mxu0 %v2709_v57  ;;  %2131 = vmatpush3.bf16.msra.mxu1 %v2709_v57  ;;  %v2185_v57 = vld [vmem:[%s3221_s3 + $0x64] ss:$8 sps:$4 sm:$0xff]   ;;  %v1119_v13 = vpop.permute.xlu1 %1118 }
 0x145   : > { %1963 = vmatprep.subr.bf16.mxu0 %v989_v53  ;;  %2124 = vmatprep.subr.bf16.mxu1 %v989_v53  ;;  %v1114_v23 = vpop.permute.xlu0 %1113 }
 0x148   : > { %1964 = vmatpush3.bf16.msra.mxu0 %v2711_v62  ;;  %2132 = vmatpush3.bf16.msra.mxu1 %v2711_v62  ;;  %v2188_v62 = vld [vmem:[%s3221_s3 + $0x60] ss:$8 sps:$4 sm:$0xff]   ;;  %v2962_v26 = vpop.permute.xlu1 %1188 }
 0x149   : > { %v2960_v31 = vpop.permute.xlu0 %1183 }
 0x14b   : > { %1414 = vmatmul.mubr.bf16.vlgmr.msra.gmra.mxu0 %v2177_v15  ;;  %1454 = vmatmul.mubr.bf16.vlgmr.msra.gmra.mxu1 %v2180_v4 }
 0x14c   : > { %1421 = vmatprep.mubr.bf16.mxu0 %v2183_v21  ;;  %1461 = vmatprep.mubr.bf16.mxu1 %v2185_v57  ;;  %v2966_v51 = vpop.permute.xlu1 %1108 }
 0x14d   : > { %v2964_v10 = vpop.permute.xlu0 %1103 }
 0x150   : > { %v2970_v42 = vpop.permute.xlu1 %1178 }
 0x151   : > { %v2968_v38 = vpop.permute.xlu0 %1173 }
 0x153   : > { %1422 = vmatmul.mubr.bf16.gmra.mxu0 %v2187_v28  ;;  %1462 = vmatmul.mubr.bf16.gmra.mxu1 %v2188_v62 }
 0x154   : > { %1429 = vmatprep.mubr.bf16.mxu0 %v2189_v33  ;;  %1469 = vmatprep.mubr.bf16.mxu1 %v2191_v22  ;;  %v2974_v18 = vpop.permute.xlu1 %1098  ;;  %v2227_v22 = vld [vmem:[%s3223_s5 + $0x4] ss:$8 sps:$4 sm:$0xff]  }
 0x155   : > { %v2972_v61 = vpop.permute.xlu0 %1093 }
 0x158   : > { %v2978_v56 = vpop.permute.xlu1 %1168 }
 0x159   : > { %v2976_v29 = vpop.permute.xlu0 %1163 }
 0x15b   : > { %1430 = vmatmul.mubr.bf16.gmra.mxu0 %v2193_v30  ;;  %1470 = vmatmul.mubr.bf16.gmra.mxu1 %v2194_v32 }
 0x15c   : > { %1437 = vmatprep.mubr.bf16.mxu0 %v2195_v35  ;;  %1477 = vmatprep.mubr.bf16.mxu1 %v2197_v2  ;;  %v2989_v30 = vpop.permute.xlu1 %1088 }
 0x15d   : > { %v2982_v53 = vpop.permute.xlu0 %1083 }
 0x15e   : > { %3237 = vst [vmem:[#allocation3_spill] sm:$0xff] %v2982_v53 }
 0x161   : > { %v1154_v2 = vpop.permute.xlu0 %1153 }
 0x163   : > { %1438 = vmatmul.mubr.bf16.gmra.mxu0 %v2199_v48  ;;  %1478 = vmatmul.mubr.bf16.gmra.mxu1 %v2200_v63 }
 0x164   : > { %1445 = vmatprep.mubr.bf16.mxu0 %v2201_v45  ;;  %1485 = vmatprep.mubr.bf16.mxu1 %v2203_v60 }
 0x16b   : > { %1446 = vmatmul.mubr.bf16.gmra.mxu0 %v2205_v46  ;;  %1486 = vmatmul.mubr.bf16.gmra.mxu1 %v2206_v16 }
 0x16c   : > { %1493 = vmatprep.mubr.bf16.mxu1 %v2207_v43  ;;  %1742 = vmatprep.mubr.bf16.mxu0 %v2227_v22 }
 0x173   : > { %1494 = vmatmul.mubr.bf16.gmra.mxu1 %v2209_v41  ;;  %v1159_v41 = vpop.permute.xlu1 %1158 }
 0x174   : > { %1501 = vmatprep.mubr.bf16.mxu1 %v2210_v5 }
 0x17b   : > { %1502 = vmatmul.mubr.bf16.gmra.mxu1 %v2212_v6 }
 0x17c   : > { %1509 = vmatprep.mubr.bf16.mxu1 %v2213_v54  ;;  %v2995_v54 = vpop.permute.xlu0 %1073 }
 0x17d   : > { %3241 = vst [vmem:[#allocation7_spill] sm:$0xff] %v2995_v54 }
 0x183   : > { %1510 = vmatmul.mubr.bf16.gmra.mxu1 %v2215_v59 }
 0x184   : > { %1517 = vmatprep.mubr.bf16.mxu1 %v2216_v11 }
 0x18b   : > { %1518 = vmatmul.mubr.bf16.gmra.mxu1 %v2218_v40 }
 0x18c   : > { %1525 = vmatprep.mubr.bf16.mxu1 %v2219_v20 }
 0x193   : > { %1526 = vmatmul.mubr.bf16.gmra.mxu1 %v2221_v52 }
 0x194   : > { %1533 = vmatprep.mubr.bf16.mxu1 %v2222_v8 }
 0x19b   : > { %1534 = vmatmul.mubr.bf16.gmra.mxu1 %v2224_v47 }
 0x20b   : > { %v1995_v27 = vpop.f32.mrf.mxu1  ;;  %v2980_v1 = vpop.f32.mrf.mxu0 }
 0x20c   : > { %3236 = vst [vmem:[#allocation2_spill] sm:$0xff] %v2980_v1 }
 0x20d   : > { %v1996_v25 = vpop.f32.mrf.mxu1  ;;  %v2984_v28 = vpop.f32.mrf.mxu0 }
 0x20e   : > { %v1997_v37 = vadd.f32 %v1996_v25, %v1995_v27  ;;  %3238 = vst [vmem:[#allocation4_spill] sm:$0xff] %v2984_v28 }
 0x20f   : > { %v1998_v34 = vpop.f32.mrf.mxu1  ;;  %v2991_v63 = vpop.f32.mrf.mxu0 }
 0x210   : > { %v1456_v50 = vadd.f32 %v1997_v37, %v1114_v23  ;;  %3239 = vst [vmem:[#allocation5_spill] sm:$0xff] %v2991_v63 }
 0x211   : > { %v1999_v36 = vpop.f32.mrf.mxu1  ;;  %v2993_v5 = vpop.f32.mrf.mxu0 }
 0x212   : > { %v1552_v12 = vmul.f32 0.5, %v1456_v50  ;;  %v2000_v49 = vadd.f32 %v1999_v36, %v1998_v34  ;;  %3240 = vst [vmem:[#allocation6_spill] sm:$0xff] %v2993_v5 }
 0x213   : > { %v2001_v24 = vpop.f32.mrf.mxu1  ;;  %v2997_v8 = vpop.f32.mrf.mxu0 }
 0x214   : > { %v1459_v39 = vadd.f32 %v2000_v49, %v1119_v13  ;;  %2292 = vtanh.f32 %v1552_v12  ;;  %3242 = vst [vmem:[#allocation8_spill] sm:$0xff] %v2997_v8  ;;  %v3000_v13 = vpop.permute.xlu1 %1078 }
 0x215   : > { %v2002_v15 = vpop.f32.mrf.mxu1  ;;  %3243 = vst [vmem:[#allocation9_spill] sm:$0xff] %v3000_v13  ;;  %v3002_v50 = vpop.f32.mrf.mxu0 }
 0x216   : > { %v1553_v4 = vmul.f32 0.5, %v1459_v39  ;;  %v2003_v21 = vadd.f32 %v2002_v15, %v2001_v24  ;;  %3244 = vst [vmem:[#allocation10_spill] sm:$0xff] %v3002_v50 }
 0x217   : > { %v2004_v57 = vpop.f32.mrf.mxu1  ;;  %v3010_v22 = vpop.f32.mrf.mxu0 }
 0x218   : > { %v1464_v62 = vadd.f32 %v2003_v21, %v1124_v55  ;;  %2294 = vtanh.f32 %v1553_v4 }
 0x219   : > { %v2005_v33 = vpop.f32.mrf.mxu1 }
 0x21a   : > { %v1554_v32 = vmul.f32 0.5, %v1464_v62  ;;  %v2006_v35 = vadd.f32 %v2005_v33, %v2004_v57  ;;  %v1149_v33 = vpop.permute.xlu1 %1148 }
 0x21b   : > { %v2007_v48 = vpop.f32.mrf.mxu1 }
 0x21c   : > { %v1467_v45 = vadd.f32 %v2006_v35, %v1129_v44  ;;  %2296 = vtanh.f32 %v1554_v32 }
 0x21d   : > { %v2008_v60 = vpop.f32.mrf.mxu1 }
 0x21e   : > { %v1555_v46 = vmul.f32 0.5, %v1467_v45  ;;  %v2009_v16 = vadd.f32 %v2008_v60, %v2007_v48 }
 0x21f   : > { %v2010_v43 = vpop.f32.mrf.mxu1 }
 0x220   : > { %v1472_v6 = vadd.f32 %v2009_v16, %v1134_v14  ;;  %2298 = vtanh.f32 %v1555_v46  ;;  %v1144_v14 = vpop.permute.xlu0 %1143 }
 0x221   : > { %v2011_v59 = vpop.f32.mrf.mxu1  ;;  %v2293_v11 = vpop.eup %2292 }
 0x222   : > { %v1556_v40 = vmul.f32 0.5, %v1472_v6  ;;  %v2012_v20 = vadd.f32 %v2011_v59, %v2010_v43  ;;  %v1616_v47 = vadd.f32 1.0, %v2293_v11  ;;  %v3012_v6 = vpop.f32.mrf.mxu0 }
 0x223   : > { %v2013_v52 = vpop.f32.mrf.mxu1 }
 0x224   : > { %2300 = vtanh.f32 %v1556_v40  ;;  %v1475_v55 = vadd.f32 %v2012_v20, %v2950_v58  ;;  %v3004_v49 = vmul.f32 %v1616_v47, %v1552_v12 }
 0x225   : > { %v2014_v44 = vpop.f32.mrf.mxu1  ;;  %v2295_v23 = vpop.eup %2294 }
 0x226   : > { %v2015_v27 = vadd.f32 %v2014_v44, %v2013_v52  ;;  %v1617_v25 = vadd.f32 1.0, %v2295_v23  ;;  %v1557_v37 = vmul.f32 0.5, %v1475_v55  ;;  %3245 = vst [vmem:[#allocation11_spill] sm:$0xff] %v3004_v49 }
 0x227   : > { %v2016_v34 = vpop.f32.mrf.mxu1 }
 0x228   : > { %v1480_v36 = vadd.f32 %v2015_v27, %v1144_v14  ;;  %v3006_v24 = vmul.f32 %v1617_v25, %v1553_v4  ;;  %2302 = vtanh.f32 %v1557_v37  ;;  %v3022_v27 = vpop.f32.mrf.mxu0 }
 0x229   : > { %v2017_v39 = vpop.f32.mrf.mxu1  ;;  %v2297_v15 = vpop.eup %2296 }
 0x22a   : > { %3246 = vst [vmem:[#allocation12_spill] sm:$0xff] %v3006_v24  ;;  %v1558_v58 = vmul.f32 0.5, %v1480_v36  ;;  %v2018_v57 = vadd.f32 %v2017_v39, %v2016_v34  ;;  %v1618_v35 = vadd.f32 1.0, %v2297_v15  ;;  %v3028_v39 = vpop.f32.mrf.mxu0 }
 0x22b   : > { %v2019_v62 = vpop.f32.mrf.mxu1 }
 0x22c   : > { %v1483_v48 = vadd.f32 %v2018_v57, %v1149_v33  ;;  %2304 = vtanh.f32 %v1558_v58  ;;  %v3014_v11 = vmul.f32 %v1618_v35, %v1554_v32 }
 0x22d   : > { %v2020_v45 = vpop.f32.mrf.mxu1  ;;  %v2299_v60 = vpop.eup %2298 }
 0x22e   : > { %v2021_v12 = vadd.f32 %v2020_v45, %v2019_v62  ;;  %v1619_v4 = vadd.f32 1.0, %v2299_v60  ;;  %v1559_v16 = vmul.f32 0.5, %v1483_v48  ;;  %3247 = vst [vmem:[#allocation13_spill] sm:$0xff] %v3014_v11 }
 0x22f   : > { %v2022_v43 = vpop.f32.mrf.mxu1 }
 0x230   : > { %v1488_v59 = vadd.f32 %v2021_v12, %v1154_v2  ;;  %v3016_v20 = vmul.f32 %v1619_v4, %v1555_v46  ;;  %2306 = vtanh.f32 %v1559_v16 }
 0x231   : > { %v2023_v52 = vpop.f32.mrf.mxu1  ;;  %v2301_v47 = vpop.eup %2300 }
 0x232   : > { %3248 = vst [vmem:[#allocation14_spill] sm:$0xff] %v3016_v20  ;;  %v1560_v44 = vmul.f32 0.5, %v1488_v59  ;;  %v2024_v14 = vadd.f32 %v2023_v52, %v2022_v43  ;;  %v1620_v25 = vadd.f32 1.0, %v2301_v47 }
 0x233   : > { %v3020_v23 = vpop.f32.mrf.mxu1 }
 0x234   : > { %2308 = vtanh.f32 %v1560_v44  ;;  %v1491_v32 = vadd.f32 %v2024_v14, %v1159_v41  ;;  %v3030_v57 = vmul.f32 %v1620_v25, %v1556_v40  ;;  %v3040_v41 = vpop.f32.mrf.mxu0 }
 0x235   : > { %v3024_v34 = vpop.f32.mrf.mxu1  ;;  %v2303_v2 = vpop.eup %2302 }
 0x236   : > { %v1621_v46 = vadd.f32 1.0, %v2303_v2  ;;  %v1561_v15 = vmul.f32 0.5, %v1491_v32  ;;  %3249 = vst [vmem:[#allocation15_spill] sm:$0xff] %v3030_v57  ;;  %v3044_v40 = vpop.f32.mrf.mxu0 }
 0x237   : > { %v3026_v36 = vpop.f32.mrf.mxu1 }
 0x238   : > { %v3032_v62 = vmul.f32 %v1621_v46, %v1557_v37  ;;  %2310 = vtanh.f32 %v1561_v15  ;;  %v3050_v2 = vpop.f32.mrf.mxu0 }
 0x239   : > { %v3034_v33 = vpop.f32.mrf.mxu1  ;;  %v2305_v35 = vpop.eup %2304 }
 0x23a   : > { %3250 = vst [vmem:[#allocation16_spill] sm:$0xff] %v3032_v62  ;;  %v1622_v12 = vadd.f32 1.0, %v2305_v35  ;;  %v1984_v48 = vpop.f32.mrf.mxu0 }
 0x23b   : > { %v3038_v45 = vpop.f32.mrf.mxu1 }
 0x23c   : > { %v3046_v52 = vmul.f32 %v1622_v12, %v1558_v58  ;;  %v1986_v12 = vpop.f32.mrf.mxu0 }
 0x23d   : > { %v3042_v60 = vpop.f32.mrf.mxu1  ;;  %v2307_v4 = vpop.eup %2306 }
 0x23e   : > { %v1623_v37 = vadd.f32 1.0, %v2307_v4  ;;  %3251 = vst [vmem:[#allocation17_spill] sm:$0xff] %v3046_v52  ;;  %v1987_v57 = vpop.f32.mrf.mxu0 }
 0x23f   : > { %v2034_v43 = vpop.f32.mrf.mxu1 }
 0x240   : > { %v3048_v47 = vmul.f32 %v1623_v37, %v1559_v16 }
 0x241   : > { %v2035_v59 = vpop.f32.mrf.mxu1  ;;  %v2309_v14 = vpop.eup %2308 }
 0x242   : > { %3252 = vst [vmem:[#allocation18_spill] sm:$0xff] %v3048_v47  ;;  %v1624_v21 = vadd.f32 1.0, %v2309_v14  ;;  %v1989_v14 = vpop.f32.mrf.mxu0 }
 0x243   : > { %v2037_v25 = vpop.f32.mrf.mxu1 }
 0x244   : > { %v3054_v4 = vmul.f32 %v1624_v21, %v1560_v44  ;;  %v1990_v54 = vpop.f32.mrf.mxu0 }
 0x245   : > { %v2038_v46 = vpop.f32.mrf.mxu1  ;;  %v2311_v35 = vpop.eup %2310 }
 0x246   : > { %v1625_v49 = vadd.f32 1.0, %v2311_v35  ;;  %3253 = vst [vmem:[#allocation19_spill] sm:$0xff] %v3054_v4 }
 0x247   : > { %v2040_v55 = vpop.f32.mrf.mxu1 }
 0x248   : > { %v3056_v58 = vmul.f32 %v1625_v49, %v1561_v15  ;;  %v1992_v15 = vpop.f32.mrf.mxu0 }
 0x249   : > { %v2041_v24 = vpop.f32.mrf.mxu1 }
 0x24a   : > { %3254 = vst [vmem:[#allocation20_spill] sm:$0xff] %v3056_v58  ;;  %v1993_v50 = vpop.f32.mrf.mxu0  ;;  %v2042_v8 = vadd.f32 %v2041_v24, %v2040_v55 }
 0x24b   : > { %v2043_v16 = vpop.f32.mrf.mxu1 }
 0x24d   : > { %v2044_v11 = vpop.f32.mrf.mxu1 }
 0x24e   : > { %v2045_v5 = vadd.f32 %v2044_v11, %v2043_v16  ;;  %v3260_v16 = vld [vmem:[#allocation9_spill] sm:$0xff] }
 0x24f   : > { %v2046_v20 = vpop.f32.mrf.mxu1 }
 0x251   : > { %v2047_v32 = vpop.f32.mrf.mxu1 }
 0x252   : > { %v2048_v44 = vadd.f32 %v2047_v32, %v2046_v20 }
 0x253   : > { %v2049_v52 = vpop.f32.mrf.mxu1 }
 0x254   : > { %v1523_v58 = vadd.f32 %v2048_v44, %v2958_v19  ;;  %v2036_v19 = vadd.f32 %v2035_v59, %v2034_v43 }
 0x255   : > { %v2050_v47 = vpop.f32.mrf.mxu1 }
 0x256   : > { %v2051_v28 = vadd.f32 %v2050_v47, %v2049_v52  ;;  %v1520_v47 = vadd.f32 %v2045_v5, %v2956_v9  ;;  %v2033_v9 = vadd.f32 %v3042_v60, %v3038_v45 }
 0x257   : > { %v2052_v62 = vpop.f32.mrf.mxu1 }
 0x258   : > { %v1528_v37 = vadd.f32 %v2051_v28, %v2952_v0  ;;  %v1994_v0 = vadd.f32 %v1993_v50, %v1992_v15  ;;  %v3071_v28 = vmul.f32 0.5, %v1523_v58  ;;  %v3080_v24 = vmul.f32 0.5, %v1520_v47  ;;  %v3262_v15 = vld [vmem:[#allocation4_spill] sm:$0xff] }
 0x259   : > { %v2053_v35 = vpop.f32.mrf.mxu1  ;;  %v1988_v50 = vadd.f32 %v1987_v57, %v1986_v12  ;;  %v2027_v57 = vadd.f32 %v3024_v34, %v3020_v23 }
 0x25a   : > { %v2054_v21 = vadd.f32 %v2053_v35, %v2052_v62  ;;  %v2039_v62 = vadd.f32 %v2038_v46, %v2037_v25  ;;  %v3067_v32 = vmul.f32 0.5, %v1528_v37  ;;  %v1451_v55 = vadd.f32 %v1994_v0, %v2966_v51  ;;  %v3257_v25 = vld [vmem:[#allocation3_spill] sm:$0xff] }
 0x25b   : > { %v2055_v49 = vpop.f32.mrf.mxu1  ;;  %v1504_v51 = vadd.f32 %v2033_v9, %v2968_v38  ;;  %v1496_v34 = vadd.f32 %v2027_v57, %v2976_v29  ;;  %v3255_v29 = vld [vmem:[#allocation8_spill] sm:$0xff]  ;;  %v1064_v9 = vpop.permute.xlu0 %1063 }
 0x25c   : > { %v1531_v1 = vadd.f32 %v2054_v21, %v2954_v7  ;;  %v1512_v5 = vadd.f32 %v2039_v62, %v2960_v31  ;;  %v1985_v31 = vadd.f32 %v1984_v48, %v3050_v2  ;;  %v3263_v62 = vld [vmem:[#allocation7_spill] sm:$0xff] }
 0x25d   : > { %v2056_v13 = vpop.f32.mrf.mxu1 }
 0x25e   : > { %v2057_v4 = vadd.f32 %v2056_v13, %v2055_v49  ;;  %v3063_v63 = vmul.f32 0.5, %v1531_v1  ;;  %v1515_v1 = vadd.f32 %v2042_v8, %v2962_v26  ;;  %v1991_v13 = vadd.f32 %v1990_v54, %v1989_v14  ;;  %v3261_v49 = vld [vmem:[#allocation2_spill] sm:$0xff] }
 0x25f   : > { %v2058_v53 = vpop.f32.mrf.mxu1  ;;  %v1507_v26 = vadd.f32 %v2036_v19, %v2970_v42  ;;  %v3098_v45 = vmul.f32 0.5, %v1512_v5  ;;  %v1982_v42 = vadd.f32 %v3044_v40, %v3040_v41  ;;  %v1440_v38 = vadd.f32 %v1985_v31, %v2972_v61  ;;  %v3256_v40 = vld [vmem:[#allocation10_spill] sm:$0xff] }
 0x260   : > { %v1536_v52 = vadd.f32 %v2057_v4, %v2946_v3  ;;  %2312 = vtanh.f32 %v3063_v63  ;;  %v3090_v54 = vmul.f32 0.5, %v1515_v1  ;;  %v1448_v8 = vadd.f32 %v1991_v13, %v2964_v10  ;;  %v3259_v4 = vld [vmem:[#allocation6_spill] sm:$0xff] }
 0x261   : > { %v2059_v20 = vpop.f32.mrf.mxu1  ;;  %v3107_v60 = vmul.f32 0.5, %v1507_v26  ;;  %v1979_v10 = vadd.f32 %v3028_v39, %v3022_v27  ;;  %v3116_v41 = vmul.f32 0.5, %v1504_v51  ;;  %v1973_v59 = vadd.f32 %v3256_v40, %v3255_v29 }
 0x262   : > { %v3069_v7 = vmul.f32 0.5, %v1536_v52  ;;  %v2060_v11 = vadd.f32 %v2059_v20, %v2058_v53  ;;  %v3113_v23 = vmul.f32 0.5, %v1448_v8  ;;  %v3131_v46 = vmul.f32 0.5, %v1440_v38 }
 0x263   : > { %v1432_v2 = vadd.f32 %v1979_v10, %v3257_v25  ;;  %v1967_v52 = vadd.f32 %v3262_v15, %v3261_v49  ;;  %v1424_v20 = vadd.f32 %v1973_v59, %v3263_v62 }
 0x264   : > { %2314 = vtanh.f32 %v3069_v7  ;;  %v1539_v3 = vadd.f32 %v2060_v11, %v2948_v17  ;;  %v2030_v17 = vadd.f32 %v3034_v33, %v3026_v36  ;;  %v1443_v36 = vadd.f32 %v1988_v50, %v2974_v18  ;;  %v1069_v11 = vpop.permute.xlu1 %1068 }
 0x265   : > { %2316 = vtanh.f32 %v3067_v32  ;;  %v3104_v33 = vmul.f32 0.5, %v1451_v55  ;;  %v1976_v18 = vadd.f32 %v3012_v6, %v3010_v22  ;;  %v3258_v6 = vld [vmem:[#allocation5_spill] sm:$0xff]  ;;  %v3147_v47 = vmul.f32 0.5, %v1432_v2 }
 0x266   : > { %v3083_v53 = vmul.f32 0.5, %v1539_v3  ;;  %2318 = vtanh.f32 %v3071_v28  ;;  %v1499_v48 = vadd.f32 %v2030_v17, %v2978_v56  ;;  %v1435_v56 = vadd.f32 %v1982_v42, %v2989_v30 }
 0x267   : > { %v3122_v43 = vmul.f32 0.5, %v1443_v36  ;;  %v3134_v30 = vmul.f32 0.5, %v1496_v34  ;;  %v1970_v58 = vadd.f32 %v3259_v4, %v3258_v6  ;;  %v1427_v12 = vadd.f32 %v1976_v18, %v3260_v16  ;;  %v3264_v18 = vld [vmem:[#allocation16_spill] sm:$0xff]  ;;  %v3268_v16 = vld [vmem:[#allocation13_spill] sm:$0xff] }
 0x268   : > { %2320 = vtanh.f32 %v3083_v53  ;;  %v3125_v39 = vmul.f32 0.5, %v1499_v48  ;;  %v3140_v37 = vmul.f32 0.5, %v1435_v56  ;;  %v1416_v31 = vadd.f32 %v1967_v52, %v1064_v9  ;;  %v3265_v56 = vld [vmem:[#allocation15_spill] sm:$0xff] }
 0x269   : > { %2322 = vtanh.f32 %v3080_v24  ;;  %v1419_v3 = vadd.f32 %v1970_v58, %v1069_v11  ;;  %v3151_v13 = vmul.f32 0.5, %v1427_v12  ;;  %v3157_v8 = vmul.f32 0.5, %v1424_v20  ;;  %v3267_v58 = vld [vmem:[#allocation14_spill] sm:$0xff] }
 0x26a   : > { %2324 = vtanh.f32 %v3090_v54  ;;  %v3165_v34 = vmul.f32 0.5, %v1416_v31  ;;  %v3269_v12 = vpack.c.bf16 %v3267_v58, %v3268_v16 }
 0x26b   : > { %2326 = vtanh.f32 %v3098_v45  ;;  %v3161_v48 = vmul.f32 0.5, %v1419_v3 }
 0x26c   : > { %2328 = vtanh.f32 %v3104_v33 }
 0x26d   : > { %v2313_v27 = vpop.eup %2312  ;;  %2330 = vtanh.f32 %v3107_v60 }
 0x26e   : > { %2332 = vtanh.f32 %v3113_v23  ;;  %v1635_v35 = vadd.f32 1.0, %v2313_v27 }
 0x26f   : > { %2334 = vtanh.f32 %v3116_v41 }
 0x270   : > { %2336 = vtanh.f32 %v3122_v43  ;;  %v1667_v50 = vmul.f32 %v1635_v35, %v3063_v63 }
 0x271   : > { %v2315_v61 = vpop.eup %2314  ;;  %2338 = vtanh.f32 %v3125_v39 }
 0x272   : > { %v2317_v22 = vpop.eup %2316  ;;  %v1636_v21 = vadd.f32 1.0, %v2315_v61  ;;  %2340 = vtanh.f32 %v3131_v46 }
 0x273   : > { %v2319_v14 = vpop.eup %2318  ;;  %2342 = vtanh.f32 %v3134_v30  ;;  %v1634_v0 = vadd.f32 1.0, %v2317_v22 }
 0x274   : > { %2344 = vtanh.f32 %v3140_v37  ;;  %v1633_v5 = vadd.f32 1.0, %v2319_v14  ;;  %v1668_v55 = vmul.f32 %v1636_v21, %v3069_v7 }
 0x275   : > { %v2321_v44 = vpop.eup %2320  ;;  %2346 = vtanh.f32 %v3147_v47  ;;  %v1666_v51 = vmul.f32 %v1634_v0, %v3067_v32  ;;  %v3266_v32 = vpack.c.bf16 %v3264_v18, %v3265_v56  ;;  %v3270_v0 = vld [vmem:[#allocation12_spill] sm:$0xff] }
 0x276   : > { %v1637_v19 = vadd.f32 1.0, %v2321_v44  ;;  %v2323_v1 = vpop.eup %2322  ;;  %2348 = vtanh.f32 %v3151_v13  ;;  %v1665_v7 = vmul.f32 %v1633_v5, %v3071_v28  ;;  %v3273_v18 = vld [vmem:[#allocation20_spill] sm:$0xff] }
 0x277   : > { %v2325_v26 = vpop.eup %2324  ;;  %v1632_v57 = vadd.f32 1.0, %v2323_v1  ;;  %2350 = vtanh.f32 %v3157_v8 }
 0x278   : > { %v1669_v17 = vmul.f32 %v1637_v19, %v3083_v53  ;;  %v2327_v36 = vpop.eup %2326  ;;  %v1631_v10 = vadd.f32 1.0, %v2325_v26  ;;  %v1684_v53 = vpack.c.bf16 %v1667_v50, %v1666_v51  ;;  %2352 = vtanh.f32 %v3161_v48  ;;  %v3271_v19 = vld [vmem:[#allocation11_spill] sm:$0xff] }
 0x279   : > { %v2329_v63 = vpop.eup %2328  ;;  %v1630_v61 = vadd.f32 1.0, %v2327_v36  ;;  %v1664_v29 = vmul.f32 %v1632_v57, %v3080_v24  ;;  %2354 = vtanh.f32 %v3165_v34  ;;  %v3272_v1 = vpack.c.bf16 %v3270_v0, %v3271_v19 }
 0x27a   : > { %v1685_v42 = vpack.c.bf16 %v1669_v17, %v1668_v55  ;;  %v2331_v38 = vpop.eup %2330  ;;  %v1615_v28 = vadd.f32 1.0, %v2329_v63  ;;  %v1663_v2 = vmul.f32 %v1631_v10, %v3090_v54 }
 0x27b   : > { %v2333_v27 = vpop.eup %2332  ;;  %v1629_v25 = vadd.f32 1.0, %v2331_v38  ;;  %v1683_v22 = vpack.c.bf16 %v1665_v7, %v1664_v29  ;;  %v1662_v35 = vmul.f32 %v1630_v61, %v3098_v45  ;;  %v3276_v61 = vld [vmem:[#allocation18_spill] sm:$0xff]  ;;  %v3277_v29 = vld [vmem:[#allocation17_spill] sm:$0xff] }
 0x27c   : > { %2061 = vmatprep.subr.bf16.mxu0 %v1685_v42  ;;  %v2335_v40 = vpop.eup %2334  ;;  %v1614_v4 = vadd.f32 1.0, %v2333_v27  ;;  %v1647_v49 = vmul.f32 %v1615_v28, %v3104_v33 }
 0x27d   : > { %2062 = vmatpush3.bf16.msra.mxu0 %v3266_v32  ;;  %v2337_v59 = vpop.eup %2336  ;;  %v1628_v24 = vadd.f32 1.0, %v2335_v40  ;;  %v1661_v52 = vmul.f32 %v1629_v25, %v3107_v60  ;;  %v1682_v62 = vpack.c.bf16 %v1663_v2, %v1662_v35  ;;  %v3278_v40 = vpack.c.bf16 %v3276_v61, %v3277_v29 }
 0x27e   : > { %2063 = vmatprep.subr.bf16.mxu0 %v1684_v53  ;;  %v2339_v6 = vpop.eup %2338  ;;  %v1613_v44 = vadd.f32 1.0, %v2337_v59  ;;  %v1646_v11 = vmul.f32 %v1614_v4, %v3113_v23  ;;  %v1698_v4 = vpop.permute.xlu1 %1697 }
 0x27f   : > { %v2341_v14 = vpop.eup %2340  ;;  %v1627_v54 = vadd.f32 1.0, %v2339_v6  ;;  %v1660_v45 = vmul.f32 %v1628_v24, %v3116_v41 }
 0x280   : > { %v2343_v21 = vpop.eup %2342  ;;  %v1612_v20 = vadd.f32 1.0, %v2341_v14  ;;  %v1645_v33 = vmul.f32 %v1613_v44, %v3122_v43  ;;  %v1674_v50 = vpack.c.bf16 %v1647_v49, %v1646_v11 }
 0x281   : > { %2064 = vmatpush3.bf16.msra.mxu0 %v3269_v12  ;;  %v2345_v15 = vpop.eup %2344  ;;  %v1626_v9 = vadd.f32 1.0, %v2343_v21  ;;  %v1659_v60 = vmul.f32 %v1627_v54, %v3125_v39  ;;  %v1681_v17 = vpack.c.bf16 %v1661_v52, %v1660_v45 }
 0x282   : > { %2065 = vmatprep.subr.bf16.mxu0 %v1683_v22  ;;  %v2347_v3 = vpop.eup %2346  ;;  %v1611_v5 = vadd.f32 1.0, %v2345_v15  ;;  %v1644_v23 = vmul.f32 %v1612_v20, %v3131_v46 }
 0x283   : > { %v2349_v55 = vpop.eup %2348  ;;  %v1610_v26 = vadd.f32 1.0, %v2347_v3  ;;  %v1658_v57 = vmul.f32 %v1626_v9, %v3134_v30 }
 0x284   : > { %v2351_v31 = vpop.eup %2350  ;;  %v1609_v51 = vadd.f32 1.0, %v2349_v55  ;;  %v1643_v41 = vmul.f32 %v1611_v5, %v3140_v37  ;;  %v1673_v42 = vpack.c.bf16 %v1645_v33, %v1644_v23  ;;  %v3274_v37 = vld [vmem:[#allocation19_spill] sm:$0xff] }
 0x285   : > { %2066 = vmatpush3.bf16.msra.mxu0 %v3272_v1  ;;  %v2353_v36 = vpop.eup %2352  ;;  %v1680_v63 = vpack.c.bf16 %v1659_v60, %v1658_v57  ;;  %v1608_v43 = vadd.f32 1.0, %v2351_v31  ;;  %v1642_v10 = vmul.f32 %v1610_v26, %v3147_v47  ;;  %v3275_v56 = vpack.c.bf16 %v3273_v18, %v3274_v37 }
 0x286   : > { %2067 = vmatprep.subr.bf16.mxu0 %v1682_v62  ;;  %v2355_v39 = vpop.eup %2354  ;;  %v1607_v7 = vadd.f32 1.0, %v2353_v36  ;;  %v1641_v46 = vmul.f32 %v1609_v51, %v3151_v13 }
 0x287   : > { %v1672_v53 = vpack.c.bf16 %v1643_v41, %v1642_v10  ;;  %v1606_v38 = vadd.f32 1.0, %v2355_v39  ;;  %v1640_v30 = vmul.f32 %v1608_v43, %v3157_v8  ;;  %v2225_v8 = vld [vmem:[%s3223_s5] ss:$8 sps:$4 sm:$0xff]  }
 0x288   : > { %v1639_v32 = vmul.f32 %v1607_v7, %v3161_v48  ;;  %v1693_v48 = vpop.permute.xlu0 %1692 }
 0x289   : > { %2068 = vmatpush3.bf16.msra.mxu0 %v1674_v50  ;;  %v1671_v27 = vpack.c.bf16 %v1641_v46, %v1640_v30  ;;  %v1638_v47 = vmul.f32 %v1606_v38, %v3165_v34 }
 0x28a   : > { %2069 = vmatprep.subr.bf16.mxu0 %v1681_v17 }
 0x28b   : > { %v1670_v13 = vpack.c.bf16 %v1639_v32, %v1638_v47 }
 0x28d   : > { %2070 = vmatpush3.bf16.msra.mxu0 %v1673_v42 }
 0x28e   : > { %2071 = vmatprep.subr.bf16.mxu0 %v1680_v63 }
 0x291   : > { %2072 = vmatpush3.bf16.msra.mxu0 %v1672_v53 }
 0x292   : > { %2073 = vmatprep.subr.bf16.mxu0 %v3275_v56 }
 0x295   : > { %2074 = vmatpush3.bf16.msra.mxu0 %v1671_v27 }
 0x296   : > { %2075 = vmatprep.subr.bf16.mxu0 %v3278_v40 }
 0x299   : > { %2076 = vmatpush3.bf16.msra.mxu0 %v1670_v13 }
 0x29c   : > { %1743 = vmatmul.mubr.bf16.vlgmr.msra.gmra.mxu0 %v2225_v8 }
 0x35c   : > { %v2077_v28 = vpop.f32.mrf.mxu0 }
 0x35e   : > { %v2078_v59 = vpop.f32.mrf.mxu0 }
 0x35f   : > { %v2079_v25 = vadd.f32 %v2078_v59, %v2077_v28 }
 0x360   : > { %v2080_v34 = vpop.f32.mrf.mxu0 }
 0x361   : > { %v1745_v2 = vadd.f32 %v2079_v25, %v1693_v48 }
 0x362   : > { %v2081_v22 = vpop.f32.mrf.mxu0 }
 0x363   : > { %1752 = vst.msk [vmem:[%s329_s14] sm:$0xff] %vm1751_vm1, %v1745_v2  ;;  %v2082_v6 = vadd.f32 %v2081_v22, %v2080_v34 }
 0x365   : > { %v1748_v58 = vadd.f32 %v2082_v6, %v1698_v4 }
 0x367   : > { %1753 = vst.msk [vmem:[%s329_s14 + $0x8] sm:$0xff] %vm1751_vm1, %v1748_v58 }
 0x368 PF: > { %s17_s26 = sadd.s32 1, %s2378_s26   ;;  %s3279_s24 = smov %s2374_s25 }
 0x369   : > { %p14_p5 = scmp.ge.s32.totalorder %s17_s26, 4   ;;  %s3280_s25 = smov %s3282_s27 }
 0x36b   :  { %16 = sbr.rel (!%p14_p5) target bundleno = 2 (0x2), region = 81 }

</bundles_post_ra>
